<compile_context>
chip_gen: v6e
topology: v6e:2x2x1
jax: 0.10.0
libtpu: 0.0.40
codegen_flags: <defaults>
</compile_context>

<pallas_src>
import functools
import math

import jax
import jax.numpy as jnp
import numpy as np
from jax.experimental import pallas as pl
from jax.experimental.pallas import tpu as pltpu

NEG_INF = -1e9
LN_EPS = 1e-5   # PyTorch LayerNorm default eps


def _layer_norm(v, gamma, beta):
    mu = jnp.mean(v, axis=-1, keepdims=True)
    var = jnp.mean(jnp.square(v - mu), axis=-1, keepdims=True)
    return (v - mu) * jax.lax.rsqrt(var + LN_EPS) * gamma + beta


def decoder_layer_kernel(xq_ref, xkv_ref, mem_ref, tbias_ref, sbias_ref,
                         wq_sa_ref, wkv_sa_ref, wo_sa_ref, b_sa_ref,
                         wq_ca_ref, wkv_ca_ref, wo_ca_ref, b_ca_ref,
                         w1_ref, b1_ref, w2_ref, b2_ref,
                         gamma_ref, beta_ref, out_ref, *, n_heads):
    xq = xq_ref[0].astype(jnp.float32)    # (tq, D): query rows / residual stream of this tile
    xkv = xkv_ref[0]                      # (T, D):  full sequence (self-attention K/V source)
    mem = mem_ref[0]                      # (S, D):  encoder memory
    d_model = xq.shape[-1]
    dh = d_model // n_heads
    scale = 1.0 / math.sqrt(dh)

    def mha(q_in, kv_in, bias, wq_ref, wkv_ref, wo_ref, b_ref):
        # projections: bf16 operands, f32 accumulation. K|V fused into one MXU pass.
        q = jnp.dot(q_in.astype(jnp.bfloat16), wq_ref[...],
                    preferred_element_type=jnp.float32) + b_ref[0:1, :]
        kv = jnp.dot(kv_in.astype(jnp.bfloat16), wkv_ref[...],
                     preferred_element_type=jnp.float32)
        k = kv[:, :d_model] + b_ref[1:2, :]
        v = kv[:, d_model:] + b_ref[2:3, :]

        wo = wo_ref[...]                               # load once, slice the value per head
        out = jnp.zeros_like(q) + b_ref[3:4, :]        # accumulator (no concat of head outputs)
        for h in range(n_heads):                       # static unroll over heads
            qh = q[:, h * dh:(h + 1) * dh].astype(jnp.bfloat16)
            kh = k[:, h * dh:(h + 1) * dh].astype(jnp.bfloat16)
            vh = v[:, h * dh:(h + 1) * dh].astype(jnp.bfloat16)
            s = jnp.dot(qh, kh.T, preferred_element_type=jnp.float32) * scale + bias
            s = s - jnp.max(s, axis=-1, keepdims=True)
            p = jnp.exp(s)
            p = p * pl.reciprocal(jnp.sum(p, axis=-1, keepdims=True), approx=True)
            oh = jnp.dot(p.astype(jnp.bfloat16), vh, preferred_element_type=jnp.float32)
            out = out + jnp.dot(oh.astype(jnp.bfloat16), wo[h * dh:(h + 1) * dh, :],
                                preferred_element_type=jnp.float32)
        return out

    tbias = tbias_ref[...]   # (tq, T) additive mask bias (0 / -1e9), precomputed host-side
    sbias = sbias_ref[...]   # (tq, S)

    # sub-layer 1: masked self-attention + residual + layernorm (dropout == identity)
    sa = mha(xq, xkv, tbias, wq_sa_ref, wkv_sa_ref, wo_sa_ref, b_sa_ref)
    x1 = _layer_norm(xq + sa, gamma_ref[0:1, :], beta_ref[0:1, :])

    # sub-layer 2: encoder-decoder cross-attention + residual + layernorm
    ca = mha(x1, mem, sbias, wq_ca_ref, wkv_ca_ref, wo_ca_ref, b_ca_ref)
    x2 = _layer_norm(x1 + ca, gamma_ref[1:2, :], beta_ref[1:2, :])

    # sub-layer 3: position-wise feed-forward (Linear -> ReLU -> Linear) + residual + layernorm
    h1 = jnp.maximum(
        jnp.dot(x2.astype(jnp.bfloat16), w1_ref[...],
                preferred_element_type=jnp.float32) + b1_ref[...], 0.0)
    ff = jnp.dot(h1.astype(jnp.bfloat16), w2_ref[...],
                 preferred_element_type=jnp.float32) + b2_ref[...]
    x3 = _layer_norm(x2 + ff, gamma_ref[2:3, :], beta_ref[2:3, :])

    out_ref[0] = x3.astype(out_ref.dtype)


def transformer_decoder_layer(x, memory, tgt_mask, src_mask, params, n_heads, tq=None):
    B, T, D = x.shape
    S = memory.shape[1]
    F = params["w1"].shape[1]
    if tq is None:
        tq = T if T <= 128 else 128
    assert T % tq == 0, "T must be divisible by the sequence tile tq"
    n_qt = T // tq

    # ---- one-time host-side packing (would happen at weight-load time in practice) ----
    # additive mask biases: replaces per-head compare+select inside the kernel with an add
    tgt_bias = jnp.where(tgt_mask > 0, 0.0, NEG_INF).astype(jnp.float32)
    src_bias = jnp.where(src_mask > 0, 0.0, NEG_INF).astype(jnp.float32)

    def pack_attn(w, b):
        wq = w[0].astype(jnp.bfloat16)                                   # (D, D)
        wkv = jnp.concatenate([w[1], w[2]], axis=-1).astype(jnp.bfloat16)  # (D, 2D) fused K|V
        wo = w[3].astype(jnp.bfloat16)                                   # (D, D)
        return wq, wkv, wo, b.astype(jnp.float32)                        # biases stay f32

    wq_sa, wkv_sa, wo_sa, b_sa = pack_attn(params["wsa"], params["bsa"])
    wq_ca, wkv_ca, wo_ca, b_ca = pack_attn(params["wca"], params["bca"])
    w1 = params["w1"].astype(jnp.bfloat16)
    w2 = params["w2"].astype(jnp.bfloat16)
    b1 = params["b1"].astype(jnp.float32)
    b2 = params["b2"].astype(jnp.float32)
    gamma = params["gamma"].astype(jnp.float32)
    beta = params["beta"].astype(jnp.float32)

    def const(shape):
        # grid-constant block: same block index every step -> stays VMEM-resident, no re-DMA
        return pl.BlockSpec(shape, lambda b, i: (0,) * len(shape))

    in_specs = [
        pl.BlockSpec((1, tq, D), lambda b, i: (b, i, 0)),   # x: query rows of this tile
        pl.BlockSpec((1, T, D), lambda b, i: (b, 0, 0)),    # x: full sequence (self-attn K/V)
        pl.BlockSpec((1, S, D), lambda b, i: (b, 0, 0)),    # encoder memory
        pl.BlockSpec((tq, T), lambda b, i: (i, 0)),         # additive tgt-mask bias tile
        pl.BlockSpec((tq, S), lambda b, i: (i, 0)),         # additive src-mask bias tile
        const((D, D)), const((D, 2 * D)), const((D, D)), const((4, D)),   # self-attn
        const((D, D)), const((D, 2 * D)), const((D, D)), const((4, D)),   # cross-attn
        const((D, F)), const((1, F)), const((F, D)), const((1, D)),       # FFN
        const((3, D)), const((3, D)),                                     # layernorm
    ]
    out_spec = pl.BlockSpec((1, tq, D), lambda b, i: (b, i, 0))

    # ---- explicit VMEM budget: blocks (double-buffered) + headroom for intermediates ----
    def nbytes(shape, dtype):
        return int(np.prod(shape)) * np.dtype(dtype).itemsize

    block_bytes = (
        2 * nbytes((1, tq, D), jnp.float32)                       # x tile + out tile
        + nbytes((1, T, D), jnp.float32) + nbytes((1, S, D), jnp.float32)
        + nbytes((tq, T), jnp.float32) + nbytes((tq, S), jnp.float32)
        + 2 * (2 * nbytes((D, D), jnp.bfloat16) + nbytes((D, 2 * D), jnp.bfloat16)
               + nbytes((4, D), jnp.float32))
        + nbytes((D, F), jnp.bfloat16) + nbytes((F, D), jnp.bfloat16)
        + nbytes((1, F), jnp.float32) + nbytes((1, D), jnp.float32)
        + 2 * nbytes((3, D), jnp.float32)
    )
    inter_bytes = (4 * nbytes((tq, F), jnp.float32)               # FFN intermediate
                   + 8 * nbytes((tq, max(T, S)), jnp.float32)     # scores / probs
                   + 12 * nbytes((tq, D), jnp.float32))           # q/k/v/residuals
    vmem_limit = int(min(2 * block_bytes + inter_bytes + (8 << 20), 96 << 20))

    kernel = functools.partial(decoder_layer_kernel, n_heads=n_heads)
    return pl.pallas_call(
        kernel,
        out_shape=jax.ShapeDtypeStruct((B, T, D), jnp.float32),
        grid_spec=pltpu.PrefetchScalarGridSpec(
            num_scalar_prefetch=0,
            grid=(B, n_qt),
            in_specs=in_specs,
            out_specs=out_spec,
        ),
        compiler_params=pltpu.CompilerParams(
            dimension_semantics=("parallel", "parallel"),
            vmem_limit_bytes=vmem_limit,
        ),
    )(x, x, memory, tgt_bias, src_bias,
      wq_sa, wkv_sa, wo_sa, b_sa,
      wq_ca, wkv_ca, wo_ca, b_ca,
      w1, b1, w2, b2, gamma, beta)


def reference(x, memory, tgt_mask, src_mask, p, n_heads, mm_dtype=jnp.bfloat16):
    """Pure-JAX reference with the same matmul-operand dtype as the kernel."""
    def ln(v, g, b):
        mu = v.mean(-1, keepdims=True)
        var = ((v - mu) ** 2).mean(-1, keepdims=True)
        return (v - mu) * jax.lax.rsqrt(var + LN_EPS) * g + b

    def cast(a):
        return a.astype(mm_dtype)

    def mha(q_in, kv_in, mask, W, b):
        B, Tq, D = q_in.shape
        Tk = kv_in.shape[1]
        dh = D // n_heads
        scale = 1.0 / math.sqrt(dh)
        q = jnp.einsum("btd,de->bte", cast(q_in), cast(W[0]),
                       preferred_element_type=jnp.float32) + b[0]
        k = jnp.einsum("btd,de->bte", cast(kv_in), cast(W[1]),
                       preferred_element_type=jnp.float32) + b[1]
        v = jnp.einsum("btd,de->bte", cast(kv_in), cast(W[2]),
                       preferred_element_type=jnp.float32) + b[2]
        q = cast(q).reshape(B, Tq, n_heads, dh).transpose(0, 2, 1, 3)
        k = cast(k).reshape(B, Tk, n_heads, dh).transpose(0, 2, 1, 3)
        v = cast(v).reshape(B, Tk, n_heads, dh).transpose(0, 2, 1, 3)
        s = jnp.einsum("bhqd,bhkd->bhqk", q, k,
                       preferred_element_type=jnp.float32) * scale
        s = jnp.where(mask[None, None] > 0, s, NEG_INF)
        a = jax.nn.softmax(s, axis=-1)
        o = jnp.einsum("bhqk,bhkd->bhqd", cast(a), v,
                       preferred_element_type=jnp.float32)
        o = o.transpose(0, 2, 1, 3).reshape(B, Tq, D)
        return jnp.einsum("btd,de->bte", cast(o), cast(W[3]),
                          preferred_element_type=jnp.float32) + b[3]

    x1 = ln(x + mha(x, x, tgt_mask, p["wsa"], p["bsa"]), p["gamma"][0], p["beta"][0])
    x2 = ln(x1 + mha(x1, memory, src_mask, p["wca"], p["bca"]), p["gamma"][1], p["beta"][1])
    h = jnp.maximum(jnp.einsum("btd,df->btf", cast(x2), cast(p["w1"]),
                               preferred_element_type=jnp.float32) + p["b1"][0], 0.0)
    ff = jnp.einsum("btf,fd->btd", cast(h), cast(p["w2"]),
                    preferred_element_type=jnp.float32) + p["b2"][0]
    return ln(x2 + ff, p["gamma"][2], p["beta"][2])


if __name__ == "__main__":
    B, T, S = 2, 8, 8          # batch, target seq, source (memory) seq
    D, H, F = 32, 4, 64        # d_model, n_heads, d_ff

    key = jax.random.PRNGKey(0)
    ks = jax.random.split(key, 12)
    scale = 0.1
    params = {
        "wsa": jax.random.normal(ks[0], (4, D, D), jnp.float32) * scale,
        "bsa": jax.random.normal(ks[1], (4, D), jnp.float32) * scale,
        "wca": jax.random.normal(ks[2], (4, D, D), jnp.float32) * scale,
        "bca": jax.random.normal(ks[3], (4, D), jnp.float32) * scale,
        "w1": jax.random.normal(ks[4], (D, F), jnp.float32) * scale,
        "b1": jax.random.normal(ks[5], (1, F), jnp.float32) * scale,
        "w2": jax.random.normal(ks[6], (F, D), jnp.float32) * scale,
        "b2": jax.random.normal(ks[7], (1, D), jnp.float32) * scale,
        "gamma": 1.0 + jax.random.normal(ks[8], (3, D), jnp.float32) * 0.05,
        "beta": jax.random.normal(ks[9], (3, D), jnp.float32) * 0.05,
    }

    x = jax.random.normal(ks[10], (B, T, D), jnp.float32)
    memory = jax.random.normal(ks[11], (B, S, D), jnp.float32)
    tgt_mask = jnp.tril(jnp.ones((T, T), jnp.float32))   # causal mask for self-attention
    src_mask = jnp.ones((T, S), jnp.float32)             # no masking on memory

    out = transformer_decoder_layer(x, memory, tgt_mask, src_mask, params, n_heads=H)
    out = jax.block_until_ready(out)

    ref = jax.block_until_ready(
        reference(x, memory, tgt_mask, src_mask, params, n_heads=H, mm_dtype=jnp.bfloat16))
    np.testing.assert_allclose(np.asarray(out), np.asarray(ref), rtol=2e-2, atol=2e-2)

    print("KERNEL_OK")
</pallas_src>

<mosaic_0001>
module attributes {stable_mosaic.version = 11 : i64} {
  func.func @decoder_layer_kernel(%arg0: i32, %arg1: i32, %arg2: memref<1x8x32xf32, #tpu.memory_space<vmem>>, %arg3: memref<1x8x32xf32, #tpu.memory_space<vmem>>, %arg4: memref<1x8x32xf32, #tpu.memory_space<vmem>>, %arg5: memref<8x8xf32, #tpu.memory_space<vmem>>, %arg6: memref<8x8xf32, #tpu.memory_space<vmem>>, %arg7: memref<32x32xbf16, #tpu.memory_space<vmem>>, %arg8: memref<32x64xbf16, #tpu.memory_space<vmem>>, %arg9: memref<32x32xbf16, #tpu.memory_space<vmem>>, %arg10: memref<4x32xf32, #tpu.memory_space<vmem>>, %arg11: memref<32x32xbf16, #tpu.memory_space<vmem>>, %arg12: memref<32x64xbf16, #tpu.memory_space<vmem>>, %arg13: memref<32x32xbf16, #tpu.memory_space<vmem>>, %arg14: memref<4x32xf32, #tpu.memory_space<vmem>>, %arg15: memref<32x64xbf16, #tpu.memory_space<vmem>>, %arg16: memref<1x64xf32, #tpu.memory_space<vmem>>, %arg17: memref<64x32xbf16, #tpu.memory_space<vmem>>, %arg18: memref<1x32xf32, #tpu.memory_space<vmem>>, %arg19: memref<3x32xf32, #tpu.memory_space<vmem>>, %arg20: memref<3x32xf32, #tpu.memory_space<vmem>>, %arg21: memref<1x8x32xf32, #tpu.memory_space<vmem>>) attributes {dimension_semantics = [#tpu.dimension_semantics<parallel>, #tpu.dimension_semantics<parallel>], iteration_bounds = array<i64: 2, 1>, scalar_prefetch = 0 : i64, scratch_operands = 0 : i64, tpu.core_type = #tpu.core_type<tc>, window_params = [{transform_indices = @transform_0, window_bounds = array<i64: 1, 8, 32>}, {transform_indices = @transform_1, window_bounds = array<i64: 1, 8, 32>}, {transform_indices = @transform_2, window_bounds = array<i64: 1, 8, 32>}, {transform_indices = @transform_3, window_bounds = array<i64: 8, 8>}, {transform_indices = @transform_4, window_bounds = array<i64: 8, 8>}, {pipeline_mode = #tpu.pipeline_mode<synchronous>, transform_indices = @transform_5, window_bounds = array<i64: 32, 32>}, {pipeline_mode = #tpu.pipeline_mode<synchronous>, transform_indices = @transform_6, window_bounds = array<i64: 32, 64>}, {pipeline_mode = #tpu.pipeline_mode<synchronous>, transform_indices = @transform_7, window_bounds = array<i64: 32, 32>}, {pipeline_mode = #tpu.pipeline_mode<synchronous>, transform_indices = @transform_8, window_bounds = array<i64: 4, 32>}, {pipeline_mode = #tpu.pipeline_mode<synchronous>, transform_indices = @transform_9, window_bounds = array<i64: 32, 32>}, {pipeline_mode = #tpu.pipeline_mode<synchronous>, transform_indices = @transform_10, window_bounds = array<i64: 32, 64>}, {pipeline_mode = #tpu.pipeline_mode<synchronous>, transform_indices = @transform_11, window_bounds = array<i64: 32, 32>}, {pipeline_mode = #tpu.pipeline_mode<synchronous>, transform_indices = @transform_12, window_bounds = array<i64: 4, 32>}, {pipeline_mode = #tpu.pipeline_mode<synchronous>, transform_indices = @transform_13, window_bounds = array<i64: 32, 64>}, {pipeline_mode = #tpu.pipeline_mode<synchronous>, transform_indices = @transform_14, window_bounds = array<i64: 1, 64>}, {pipeline_mode = #tpu.pipeline_mode<synchronous>, transform_indices = @transform_15, window_bounds = array<i64: 64, 32>}, {pipeline_mode = #tpu.pipeline_mode<synchronous>, transform_indices = @transform_16, window_bounds = array<i64: 1, 32>}, {pipeline_mode = #tpu.pipeline_mode<synchronous>, transform_indices = @transform_17, window_bounds = array<i64: 3, 32>}, {pipeline_mode = #tpu.pipeline_mode<synchronous>, transform_indices = @transform_18, window_bounds = array<i64: 3, 32>}, {transform_indices = @transform_19, window_bounds = array<i64: 1, 8, 32>}]} {
    %c0 = arith.constant 0 : index
    %c0_0 = arith.constant 0 : index
    %c0_1 = arith.constant 0 : index
    %0 = vector.load %arg2[%c0, %c0_0, %c0_1] : memref<1x8x32xf32, #tpu.memory_space<vmem>>, vector<1x8x32xf32>
    %1 = vector.shape_cast %0 : vector<1x8x32xf32> to vector<8x32xf32>
    %c0_2 = arith.constant 0 : index
    %c0_3 = arith.constant 0 : index
    %c0_4 = arith.constant 0 : index
    %2 = vector.load %arg3[%c0_2, %c0_3, %c0_4] : memref<1x8x32xf32, #tpu.memory_space<vmem>>, vector<1x8x32xf32>
    %3 = vector.shape_cast %2 : vector<1x8x32xf32> to vector<8x32xf32>
    %c0_5 = arith.constant 0 : index
    %c0_6 = arith.constant 0 : index
    %c0_7 = arith.constant 0 : index
    %4 = vector.load %arg4[%c0_5, %c0_6, %c0_7] : memref<1x8x32xf32, #tpu.memory_space<vmem>>, vector<1x8x32xf32>
    %5 = vector.shape_cast %4 : vector<1x8x32xf32> to vector<8x32xf32>
    %c0_8 = arith.constant 0 : index
    %c0_9 = arith.constant 0 : index
    %6 = vector.load %arg5[%c0_8, %c0_9] : memref<8x8xf32, #tpu.memory_space<vmem>>, vector<8x8xf32>
    %c0_10 = arith.constant 0 : index
    %c0_11 = arith.constant 0 : index
    %7 = vector.load %arg6[%c0_10, %c0_11] : memref<8x8xf32, #tpu.memory_space<vmem>>, vector<8x8xf32>
    %8 = arith.truncf %1 : vector<8x32xf32> to vector<8x32xbf16>
    %c0_12 = arith.constant 0 : index
    %c0_13 = arith.constant 0 : index
    %9 = vector.load %arg7[%c0_12, %c0_13] : memref<32x32xbf16, #tpu.memory_space<vmem>>, vector<32x32xbf16>
    %cst = arith.constant dense<0.000000e+00> : vector<8x32xf32>
    %10 = tpu.matmul %8, %9, %cst {dimension_numbers = #tpu.dot_dimension_numbers<[1], [0], [0], [1], [0, 0, 1, 1], [], []>} : vector<8x32xbf16>, vector<32x32xbf16>, vector<8x32xf32> -> vector<8x32xf32>
    %c0_14 = arith.constant 0 : index
    %c0_15 = arith.constant 0 : index
    %11 = vector.load %arg10[%c0_14, %c0_15] : memref<4x32xf32, #tpu.memory_space<vmem>>, vector<1x32xf32>
    %12 = vector.broadcast %11 : vector<1x32xf32> to vector<8x32xf32>
    %13 = arith.addf %10, %12 : vector<8x32xf32>
    %14 = arith.truncf %3 : vector<8x32xf32> to vector<8x32xbf16>
    %c0_16 = arith.constant 0 : index
    %c0_17 = arith.constant 0 : index
    %15 = vector.load %arg8[%c0_16, %c0_17] : memref<32x64xbf16, #tpu.memory_space<vmem>>, vector<32x64xbf16>
    %cst_18 = arith.constant dense<0.000000e+00> : vector<8x64xf32>
    %16 = tpu.matmul %14, %15, %cst_18 {dimension_numbers = #tpu.dot_dimension_numbers<[1], [0], [0], [1], [0, 0, 1, 1], [], []>} : vector<8x32xbf16>, vector<32x64xbf16>, vector<8x64xf32> -> vector<8x64xf32>
    %17 = vector.extract_strided_slice %16 {offsets = [0, 0], sizes = [8, 32], strides = [1, 1]} : vector<8x64xf32> to vector<8x32xf32>
    %c1 = arith.constant 1 : index
    %c0_19 = arith.constant 0 : index
    %18 = vector.load %arg10[%c1, %c0_19] : memref<4x32xf32, #tpu.memory_space<vmem>>, vector<1x32xf32>
    %19 = vector.broadcast %18 : vector<1x32xf32> to vector<8x32xf32>
    %20 = arith.addf %17, %19 : vector<8x32xf32>
    %21 = vector.extract_strided_slice %16 {offsets = [0, 32], sizes = [8, 32], strides = [1, 1]} : vector<8x64xf32> to vector<8x32xf32>
    %c2 = arith.constant 2 : index
    %c0_20 = arith.constant 0 : index
    %22 = vector.load %arg10[%c2, %c0_20] : memref<4x32xf32, #tpu.memory_space<vmem>>, vector<1x32xf32>
    %23 = vector.broadcast %22 : vector<1x32xf32> to vector<8x32xf32>
    %24 = arith.addf %21, %23 : vector<8x32xf32>
    %c0_21 = arith.constant 0 : index
    %c0_22 = arith.constant 0 : index
    %25 = vector.load %arg9[%c0_21, %c0_22] : memref<32x32xbf16, #tpu.memory_space<vmem>>, vector<32x32xbf16>
    %cst_23 = arith.constant 0.000000e+00 : f32
    %26 = vector.broadcast %cst_23 : f32 to vector<8x32xf32>
    %c3 = arith.constant 3 : index
    %c0_24 = arith.constant 0 : index
    %27 = vector.load %arg10[%c3, %c0_24] : memref<4x32xf32, #tpu.memory_space<vmem>>, vector<1x32xf32>
    %28 = vector.broadcast %27 : vector<1x32xf32> to vector<8x32xf32>
    %29 = arith.addf %26, %28 : vector<8x32xf32>
    %30 = vector.extract_strided_slice %13 {offsets = [0, 0], sizes = [8, 8], strides = [1, 1]} : vector<8x32xf32> to vector<8x8xf32>
    %31 = arith.truncf %30 : vector<8x8xf32> to vector<8x8xbf16>
    %32 = vector.extract_strided_slice %20 {offsets = [0, 0], sizes = [8, 8], strides = [1, 1]} : vector<8x32xf32> to vector<8x8xf32>
    %33 = arith.truncf %32 : vector<8x8xf32> to vector<8x8xbf16>
    %34 = vector.extract_strided_slice %24 {offsets = [0, 0], sizes = [8, 8], strides = [1, 1]} : vector<8x32xf32> to vector<8x8xf32>
    %35 = arith.truncf %34 : vector<8x8xf32> to vector<8x8xbf16>
    %36 = tpu.transpose %33, [1, 0] : vector<8x8xbf16> -> vector<8x8xbf16>
    %cst_25 = arith.constant dense<0.000000e+00> : vector<8x8xf32>
    %37 = tpu.matmul %31, %36, %cst_25 {dimension_numbers = #tpu.dot_dimension_numbers<[1], [0], [0], [1], [0, 0, 1, 1], [], []>} : vector<8x8xbf16>, vector<8x8xbf16>, vector<8x8xf32> -> vector<8x8xf32>
    %cst_26 = arith.constant 0.353553385 : f32
    %38 = vector.broadcast %cst_26 : f32 to vector<8x8xf32>
    %39 = arith.mulf %37, %38 : vector<8x8xf32>
    %40 = arith.addf %39, %6 : vector<8x8xf32>
    %cst_27 = arith.constant dense<0xFF800000> : vector<8xf32>
    %41 = vector.multi_reduction <maximumf>, %40, %cst_27 [1] : vector<8x8xf32> to vector<8xf32>
    %42 = vector.shape_cast %41 : vector<8xf32> to vector<8x1xf32>
    %43 = vector.broadcast %42 : vector<8x1xf32> to vector<8x8xf32>
    %44 = arith.subf %40, %43 : vector<8x8xf32>
    %45 = math.exp %44 : vector<8x8xf32>
    %cst_28 = arith.constant dense<0.000000e+00> : vector<8xf32>
    %46 = vector.multi_reduction <add>, %45, %cst_28 [1] : vector<8x8xf32> to vector<8xf32>
    %47 = vector.shape_cast %46 : vector<8xf32> to vector<8x1xf32>
    %48 = tpu.reciprocal %47 {approx = true} : vector<8x1xf32> -> vector<8x1xf32>
    %49 = vector.broadcast %48 : vector<8x1xf32> to vector<8x8xf32>
    %50 = arith.mulf %45, %49 : vector<8x8xf32>
    %51 = arith.truncf %50 : vector<8x8xf32> to vector<8x8xbf16>
    %cst_29 = arith.constant dense<0.000000e+00> : vector<8x8xf32>
    %52 = tpu.matmul %51, %35, %cst_29 {dimension_numbers = #tpu.dot_dimension_numbers<[1], [0], [0], [1], [0, 0, 1, 1], [], []>} : vector<8x8xbf16>, vector<8x8xbf16>, vector<8x8xf32> -> vector<8x8xf32>
    %53 = arith.truncf %52 : vector<8x8xf32> to vector<8x8xbf16>
    %54 = vector.extract_strided_slice %25 {offsets = [0, 0], sizes = [8, 32], strides = [1, 1]} : vector<32x32xbf16> to vector<8x32xbf16>
    %cst_30 = arith.constant dense<0.000000e+00> : vector<8x32xf32>
    %55 = tpu.matmul %53, %54, %cst_30 {dimension_numbers = #tpu.dot_dimension_numbers<[1], [0], [0], [1], [0, 0, 1, 1], [], []>} : vector<8x8xbf16>, vector<8x32xbf16>, vector<8x32xf32> -> vector<8x32xf32>
    %56 = arith.addf %29, %55 : vector<8x32xf32>
    %57 = vector.extract_strided_slice %13 {offsets = [0, 8], sizes = [8, 8], strides = [1, 1]} : vector<8x32xf32> to vector<8x8xf32>
    %58 = arith.truncf %57 : vector<8x8xf32> to vector<8x8xbf16>
    %59 = vector.extract_strided_slice %20 {offsets = [0, 8], sizes = [8, 8], strides = [1, 1]} : vector<8x32xf32> to vector<8x8xf32>
    %60 = arith.truncf %59 : vector<8x8xf32> to vector<8x8xbf16>
    %61 = vector.extract_strided_slice %24 {offsets = [0, 8], sizes = [8, 8], strides = [1, 1]} : vector<8x32xf32> to vector<8x8xf32>
    %62 = arith.truncf %61 : vector<8x8xf32> to vector<8x8xbf16>
    %63 = tpu.transpose %60, [1, 0] : vector<8x8xbf16> -> vector<8x8xbf16>
    %cst_31 = arith.constant dense<0.000000e+00> : vector<8x8xf32>
    %64 = tpu.matmul %58, %63, %cst_31 {dimension_numbers = #tpu.dot_dimension_numbers<[1], [0], [0], [1], [0, 0, 1, 1], [], []>} : vector<8x8xbf16>, vector<8x8xbf16>, vector<8x8xf32> -> vector<8x8xf32>
    %cst_32 = arith.constant 0.353553385 : f32
    %65 = vector.broadcast %cst_32 : f32 to vector<8x8xf32>
    %66 = arith.mulf %64, %65 : vector<8x8xf32>
    %67 = arith.addf %66, %6 : vector<8x8xf32>
    %cst_33 = arith.constant dense<0xFF800000> : vector<8xf32>
    %68 = vector.multi_reduction <maximumf>, %67, %cst_33 [1] : vector<8x8xf32> to vector<8xf32>
    %69 = vector.shape_cast %68 : vector<8xf32> to vector<8x1xf32>
    %70 = vector.broadcast %69 : vector<8x1xf32> to vector<8x8xf32>
    %71 = arith.subf %67, %70 : vector<8x8xf32>
    %72 = math.exp %71 : vector<8x8xf32>
    %cst_34 = arith.constant dense<0.000000e+00> : vector<8xf32>
    %73 = vector.multi_reduction <add>, %72, %cst_34 [1] : vector<8x8xf32> to vector<8xf32>
    %74 = vector.shape_cast %73 : vector<8xf32> to vector<8x1xf32>
    %75 = tpu.reciprocal %74 {approx = true} : vector<8x1xf32> -> vector<8x1xf32>
    %76 = vector.broadcast %75 : vector<8x1xf32> to vector<8x8xf32>
    %77 = arith.mulf %72, %76 : vector<8x8xf32>
    %78 = arith.truncf %77 : vector<8x8xf32> to vector<8x8xbf16>
    %cst_35 = arith.constant dense<0.000000e+00> : vector<8x8xf32>
    %79 = tpu.matmul %78, %62, %cst_35 {dimension_numbers = #tpu.dot_dimension_numbers<[1], [0], [0], [1], [0, 0, 1, 1], [], []>} : vector<8x8xbf16>, vector<8x8xbf16>, vector<8x8xf32> -> vector<8x8xf32>
    %80 = arith.truncf %79 : vector<8x8xf32> to vector<8x8xbf16>
    %81 = vector.extract_strided_slice %25 {offsets = [8, 0], sizes = [8, 32], strides = [1, 1]} : vector<32x32xbf16> to vector<8x32xbf16>
    %cst_36 = arith.constant dense<0.000000e+00> : vector<8x32xf32>
    %82 = tpu.matmul %80, %81, %cst_36 {dimension_numbers = #tpu.dot_dimension_numbers<[1], [0], [0], [1], [0, 0, 1, 1], [], []>} : vector<8x8xbf16>, vector<8x32xbf16>, vector<8x32xf32> -> vector<8x32xf32>
    %83 = arith.addf %56, %82 : vector<8x32xf32>
    %84 = vector.extract_strided_slice %13 {offsets = [0, 16], sizes = [8, 8], strides = [1, 1]} : vector<8x32xf32> to vector<8x8xf32>
    %85 = arith.truncf %84 : vector<8x8xf32> to vector<8x8xbf16>
    %86 = vector.extract_strided_slice %20 {offsets = [0, 16], sizes = [8, 8], strides = [1, 1]} : vector<8x32xf32> to vector<8x8xf32>
    %87 = arith.truncf %86 : vector<8x8xf32> to vector<8x8xbf16>
    %88 = vector.extract_strided_slice %24 {offsets = [0, 16], sizes = [8, 8], strides = [1, 1]} : vector<8x32xf32> to vector<8x8xf32>
    %89 = arith.truncf %88 : vector<8x8xf32> to vector<8x8xbf16>
    %90 = tpu.transpose %87, [1, 0] : vector<8x8xbf16> -> vector<8x8xbf16>
    %cst_37 = arith.constant dense<0.000000e+00> : vector<8x8xf32>
    %91 = tpu.matmul %85, %90, %cst_37 {dimension_numbers = #tpu.dot_dimension_numbers<[1], [0], [0], [1], [0, 0, 1, 1], [], []>} : vector<8x8xbf16>, vector<8x8xbf16>, vector<8x8xf32> -> vector<8x8xf32>
    %cst_38 = arith.constant 0.353553385 : f32
    %92 = vector.broadcast %cst_38 : f32 to vector<8x8xf32>
    %93 = arith.mulf %91, %92 : vector<8x8xf32>
    %94 = arith.addf %93, %6 : vector<8x8xf32>
    %cst_39 = arith.constant dense<0xFF800000> : vector<8xf32>
    %95 = vector.multi_reduction <maximumf>, %94, %cst_39 [1] : vector<8x8xf32> to vector<8xf32>
    %96 = vector.shape_cast %95 : vector<8xf32> to vector<8x1xf32>
    %97 = vector.broadcast %96 : vector<8x1xf32> to vector<8x8xf32>
    %98 = arith.subf %94, %97 : vector<8x8xf32>
    %99 = math.exp %98 : vector<8x8xf32>
    %cst_40 = arith.constant dense<0.000000e+00> : vector<8xf32>
    %100 = vector.multi_reduction <add>, %99, %cst_40 [1] : vector<8x8xf32> to vector<8xf32>
    %101 = vector.shape_cast %100 : vector<8xf32> to vector<8x1xf32>
    %102 = tpu.reciprocal %101 {approx = true} : vector<8x1xf32> -> vector<8x1xf32>
    %103 = vector.broadcast %102 : vector<8x1xf32> to vector<8x8xf32>
    %104 = arith.mulf %99, %103 : vector<8x8xf32>
    %105 = arith.truncf %104 : vector<8x8xf32> to vector<8x8xbf16>
    %cst_41 = arith.constant dense<0.000000e+00> : vector<8x8xf32>
    %106 = tpu.matmul %105, %89, %cst_41 {dimension_numbers = #tpu.dot_dimension_numbers<[1], [0], [0], [1], [0, 0, 1, 1], [], []>} : vector<8x8xbf16>, vector<8x8xbf16>, vector<8x8xf32> -> vector<8x8xf32>
    %107 = arith.truncf %106 : vector<8x8xf32> to vector<8x8xbf16>
    %108 = vector.extract_strided_slice %25 {offsets = [16, 0], sizes = [8, 32], strides = [1, 1]} : vector<32x32xbf16> to vector<8x32xbf16>
    %cst_42 = arith.constant dense<0.000000e+00> : vector<8x32xf32>
    %109 = tpu.matmul %107, %108, %cst_42 {dimension_numbers = #tpu.dot_dimension_numbers<[1], [0], [0], [1], [0, 0, 1, 1], [], []>} : vector<8x8xbf16>, vector<8x32xbf16>, vector<8x32xf32> -> vector<8x32xf32>
    %110 = arith.addf %83, %109 : vector<8x32xf32>
    %111 = vector.extract_strided_slice %13 {offsets = [0, 24], sizes = [8, 8], strides = [1, 1]} : vector<8x32xf32> to vector<8x8xf32>
    %112 = arith.truncf %111 : vector<8x8xf32> to vector<8x8xbf16>
    %113 = vector.extract_strided_slice %20 {offsets = [0, 24], sizes = [8, 8], strides = [1, 1]} : vector<8x32xf32> to vector<8x8xf32>
    %114 = arith.truncf %113 : vector<8x8xf32> to vector<8x8xbf16>
    %115 = vector.extract_strided_slice %24 {offsets = [0, 24], sizes = [8, 8], strides = [1, 1]} : vector<8x32xf32> to vector<8x8xf32>
    %116 = arith.truncf %115 : vector<8x8xf32> to vector<8x8xbf16>
    %117 = tpu.transpose %114, [1, 0] : vector<8x8xbf16> -> vector<8x8xbf16>
    %cst_43 = arith.constant dense<0.000000e+00> : vector<8x8xf32>
    %118 = tpu.matmul %112, %117, %cst_43 {dimension_numbers = #tpu.dot_dimension_numbers<[1], [0], [0], [1], [0, 0, 1, 1], [], []>} : vector<8x8xbf16>, vector<8x8xbf16>, vector<8x8xf32> -> vector<8x8xf32>
    %cst_44 = arith.constant 0.353553385 : f32
    %119 = vector.broadcast %cst_44 : f32 to vector<8x8xf32>
    %120 = arith.mulf %118, %119 : vector<8x8xf32>
    %121 = arith.addf %120, %6 : vector<8x8xf32>
    %cst_45 = arith.constant dense<0xFF800000> : vector<8xf32>
    %122 = vector.multi_reduction <maximumf>, %121, %cst_45 [1] : vector<8x8xf32> to vector<8xf32>
    %123 = vector.shape_cast %122 : vector<8xf32> to vector<8x1xf32>
    %124 = vector.broadcast %123 : vector<8x1xf32> to vector<8x8xf32>
    %125 = arith.subf %121, %124 : vector<8x8xf32>
    %126 = math.exp %125 : vector<8x8xf32>
    %cst_46 = arith.constant dense<0.000000e+00> : vector<8xf32>
    %127 = vector.multi_reduction <add>, %126, %cst_46 [1] : vector<8x8xf32> to vector<8xf32>
    %128 = vector.shape_cast %127 : vector<8xf32> to vector<8x1xf32>
    %129 = tpu.reciprocal %128 {approx = true} : vector<8x1xf32> -> vector<8x1xf32>
    %130 = vector.broadcast %129 : vector<8x1xf32> to vector<8x8xf32>
    %131 = arith.mulf %126, %130 : vector<8x8xf32>
    %132 = arith.truncf %131 : vector<8x8xf32> to vector<8x8xbf16>
    %cst_47 = arith.constant dense<0.000000e+00> : vector<8x8xf32>
    %133 = tpu.matmul %132, %116, %cst_47 {dimension_numbers = #tpu.dot_dimension_numbers<[1], [0], [0], [1], [0, 0, 1, 1], [], []>} : vector<8x8xbf16>, vector<8x8xbf16>, vector<8x8xf32> -> vector<8x8xf32>
    %134 = arith.truncf %133 : vector<8x8xf32> to vector<8x8xbf16>
    %135 = vector.extract_strided_slice %25 {offsets = [24, 0], sizes = [8, 32], strides = [1, 1]} : vector<32x32xbf16> to vector<8x32xbf16>
    %cst_48 = arith.constant dense<0.000000e+00> : vector<8x32xf32>
    %136 = tpu.matmul %134, %135, %cst_48 {dimension_numbers = #tpu.dot_dimension_numbers<[1], [0], [0], [1], [0, 0, 1, 1], [], []>} : vector<8x8xbf16>, vector<8x32xbf16>, vector<8x32xf32> -> vector<8x32xf32>
    %137 = arith.addf %110, %136 : vector<8x32xf32>
    %138 = arith.addf %1, %137 : vector<8x32xf32>
    %c0_49 = arith.constant 0 : index
    %c0_50 = arith.constant 0 : index
    %139 = vector.load %arg19[%c0_49, %c0_50] : memref<3x32xf32, #tpu.memory_space<vmem>>, vector<1x32xf32>
    %c0_51 = arith.constant 0 : index
    %c0_52 = arith.constant 0 : index
    %140 = vector.load %arg20[%c0_51, %c0_52] : memref<3x32xf32, #tpu.memory_space<vmem>>, vector<1x32xf32>
    %cst_53 = arith.constant dense<0.000000e+00> : vector<8xf32>
    %141 = vector.multi_reduction <add>, %138, %cst_53 [1] : vector<8x32xf32> to vector<8xf32>
    %142 = vector.shape_cast %141 : vector<8xf32> to vector<8x1xf32>
    %cst_54 = arith.constant 3.200000e+01 : f32
    %143 = vector.broadcast %cst_54 : f32 to vector<8x1xf32>
    %144 = arith.divf %142, %143 : vector<8x1xf32>
    %145 = vector.broadcast %144 : vector<8x1xf32> to vector<8x32xf32>
    %146 = arith.subf %138, %145 : vector<8x32xf32>
    %147 = arith.mulf %146, %146 : vector<8x32xf32>
    %cst_55 = arith.constant dense<0.000000e+00> : vector<8xf32>
    %148 = vector.multi_reduction <add>, %147, %cst_55 [1] : vector<8x32xf32> to vector<8xf32>
    %149 = vector.shape_cast %148 : vector<8xf32> to vector<8x1xf32>
    %cst_56 = arith.constant 3.200000e+01 : f32
    %150 = vector.broadcast %cst_56 : f32 to vector<8x1xf32>
    %151 = arith.divf %149, %150 : vector<8x1xf32>
    %152 = vector.broadcast %144 : vector<8x1xf32> to vector<8x32xf32>
    %153 = arith.subf %138, %152 : vector<8x32xf32>
    %cst_57 = arith.constant 9.99999974E-6 : f32
    %154 = vector.broadcast %cst_57 : f32 to vector<8x1xf32>
    %155 = arith.addf %151, %154 : vector<8x1xf32>
    %156 = math.rsqrt %155 : vector<8x1xf32>
    %157 = vector.broadcast %156 : vector<8x1xf32> to vector<8x32xf32>
    %158 = arith.mulf %153, %157 : vector<8x32xf32>
    %159 = vector.broadcast %139 : vector<1x32xf32> to vector<8x32xf32>
    %160 = arith.mulf %158, %159 : vector<8x32xf32>
    %161 = vector.broadcast %140 : vector<1x32xf32> to vector<8x32xf32>
    %162 = arith.addf %160, %161 : vector<8x32xf32>
    %163 = arith.truncf %162 : vector<8x32xf32> to vector<8x32xbf16>
    %c0_58 = arith.constant 0 : index
    %c0_59 = arith.constant 0 : index
    %164 = vector.load %arg11[%c0_58, %c0_59] : memref<32x32xbf16, #tpu.memory_space<vmem>>, vector<32x32xbf16>
    %cst_60 = arith.constant dense<0.000000e+00> : vector<8x32xf32>
    %165 = tpu.matmul %163, %164, %cst_60 {dimension_numbers = #tpu.dot_dimension_numbers<[1], [0], [0], [1], [0, 0, 1, 1], [], []>} : vector<8x32xbf16>, vector<32x32xbf16>, vector<8x32xf32> -> vector<8x32xf32>
    %c0_61 = arith.constant 0 : index
    %c0_62 = arith.constant 0 : index
    %166 = vector.load %arg14[%c0_61, %c0_62] : memref<4x32xf32, #tpu.memory_space<vmem>>, vector<1x32xf32>
    %167 = vector.broadcast %166 : vector<1x32xf32> to vector<8x32xf32>
    %168 = arith.addf %165, %167 : vector<8x32xf32>
    %169 = arith.truncf %5 : vector<8x32xf32> to vector<8x32xbf16>
    %c0_63 = arith.constant 0 : index
    %c0_64 = arith.constant 0 : index
    %170 = vector.load %arg12[%c0_63, %c0_64] : memref<32x64xbf16, #tpu.memory_space<vmem>>, vector<32x64xbf16>
    %cst_65 = arith.constant dense<0.000000e+00> : vector<8x64xf32>
    %171 = tpu.matmul %169, %170, %cst_65 {dimension_numbers = #tpu.dot_dimension_numbers<[1], [0], [0], [1], [0, 0, 1, 1], [], []>} : vector<8x32xbf16>, vector<32x64xbf16>, vector<8x64xf32> -> vector<8x64xf32>
    %172 = vector.extract_strided_slice %171 {offsets = [0, 0], sizes = [8, 32], strides = [1, 1]} : vector<8x64xf32> to vector<8x32xf32>
    %c1_66 = arith.constant 1 : index
    %c0_67 = arith.constant 0 : index
    %173 = vector.load %arg14[%c1_66, %c0_67] : memref<4x32xf32, #tpu.memory_space<vmem>>, vector<1x32xf32>
    %174 = vector.broadcast %173 : vector<1x32xf32> to vector<8x32xf32>
    %175 = arith.addf %172, %174 : vector<8x32xf32>
    %176 = vector.extract_strided_slice %171 {offsets = [0, 32], sizes = [8, 32], strides = [1, 1]} : vector<8x64xf32> to vector<8x32xf32>
    %c2_68 = arith.constant 2 : index
    %c0_69 = arith.constant 0 : index
    %177 = vector.load %arg14[%c2_68, %c0_69] : memref<4x32xf32, #tpu.memory_space<vmem>>, vector<1x32xf32>
    %178 = vector.broadcast %177 : vector<1x32xf32> to vector<8x32xf32>
    %179 = arith.addf %176, %178 : vector<8x32xf32>
    %c0_70 = arith.constant 0 : index
    %c0_71 = arith.constant 0 : index
    %180 = vector.load %arg13[%c0_70, %c0_71] : memref<32x32xbf16, #tpu.memory_space<vmem>>, vector<32x32xbf16>
    %cst_72 = arith.constant 0.000000e+00 : f32
    %181 = vector.broadcast %cst_72 : f32 to vector<8x32xf32>
    %c3_73 = arith.constant 3 : index
    %c0_74 = arith.constant 0 : index
    %182 = vector.load %arg14[%c3_73, %c0_74] : memref<4x32xf32, #tpu.memory_space<vmem>>, vector<1x32xf32>
    %183 = vector.broadcast %182 : vector<1x32xf32> to vector<8x32xf32>
    %184 = arith.addf %181, %183 : vector<8x32xf32>
    %185 = vector.extract_strided_slice %168 {offsets = [0, 0], sizes = [8, 8], strides = [1, 1]} : vector<8x32xf32> to vector<8x8xf32>
    %186 = arith.truncf %185 : vector<8x8xf32> to vector<8x8xbf16>
    %187 = vector.extract_strided_slice %175 {offsets = [0, 0], sizes = [8, 8], strides = [1, 1]} : vector<8x32xf32> to vector<8x8xf32>
    %188 = arith.truncf %187 : vector<8x8xf32> to vector<8x8xbf16>
    %189 = vector.extract_strided_slice %179 {offsets = [0, 0], sizes = [8, 8], strides = [1, 1]} : vector<8x32xf32> to vector<8x8xf32>
    %190 = arith.truncf %189 : vector<8x8xf32> to vector<8x8xbf16>
    %191 = tpu.transpose %188, [1, 0] : vector<8x8xbf16> -> vector<8x8xbf16>
    %cst_75 = arith.constant dense<0.000000e+00> : vector<8x8xf32>
    %192 = tpu.matmul %186, %191, %cst_75 {dimension_numbers = #tpu.dot_dimension_numbers<[1], [0], [0], [1], [0, 0, 1, 1], [], []>} : vector<8x8xbf16>, vector<8x8xbf16>, vector<8x8xf32> -> vector<8x8xf32>
    %cst_76 = arith.constant 0.353553385 : f32
    %193 = vector.broadcast %cst_76 : f32 to vector<8x8xf32>
    %194 = arith.mulf %192, %193 : vector<8x8xf32>
    %195 = arith.addf %194, %7 : vector<8x8xf32>
    %cst_77 = arith.constant dense<0xFF800000> : vector<8xf32>
    %196 = vector.multi_reduction <maximumf>, %195, %cst_77 [1] : vector<8x8xf32> to vector<8xf32>
    %197 = vector.shape_cast %196 : vector<8xf32> to vector<8x1xf32>
    %198 = vector.broadcast %197 : vector<8x1xf32> to vector<8x8xf32>
    %199 = arith.subf %195, %198 : vector<8x8xf32>
    %200 = math.exp %199 : vector<8x8xf32>
    %cst_78 = arith.constant dense<0.000000e+00> : vector<8xf32>
    %201 = vector.multi_reduction <add>, %200, %cst_78 [1] : vector<8x8xf32> to vector<8xf32>
    %202 = vector.shape_cast %201 : vector<8xf32> to vector<8x1xf32>
    %203 = tpu.reciprocal %202 {approx = true} : vector<8x1xf32> -> vector<8x1xf32>
    %204 = vector.broadcast %203 : vector<8x1xf32> to vector<8x8xf32>
    %205 = arith.mulf %200, %204 : vector<8x8xf32>
    %206 = arith.truncf %205 : vector<8x8xf32> to vector<8x8xbf16>
    %cst_79 = arith.constant dense<0.000000e+00> : vector<8x8xf32>
    %207 = tpu.matmul %206, %190, %cst_79 {dimension_numbers = #tpu.dot_dimension_numbers<[1], [0], [0], [1], [0, 0, 1, 1], [], []>} : vector<8x8xbf16>, vector<8x8xbf16>, vector<8x8xf32> -> vector<8x8xf32>
    %208 = arith.truncf %207 : vector<8x8xf32> to vector<8x8xbf16>
    %209 = vector.extract_strided_slice %180 {offsets = [0, 0], sizes = [8, 32], strides = [1, 1]} : vector<32x32xbf16> to vector<8x32xbf16>
    %cst_80 = arith.constant dense<0.000000e+00> : vector<8x32xf32>
    %210 = tpu.matmul %208, %209, %cst_80 {dimension_numbers = #tpu.dot_dimension_numbers<[1], [0], [0], [1], [0, 0, 1, 1], [], []>} : vector<8x8xbf16>, vector<8x32xbf16>, vector<8x32xf32> -> vector<8x32xf32>
    %211 = arith.addf %184, %210 : vector<8x32xf32>
    %212 = vector.extract_strided_slice %168 {offsets = [0, 8], sizes = [8, 8], strides = [1, 1]} : vector<8x32xf32> to vector<8x8xf32>
    %213 = arith.truncf %212 : vector<8x8xf32> to vector<8x8xbf16>
    %214 = vector.extract_strided_slice %175 {offsets = [0, 8], sizes = [8, 8], strides = [1, 1]} : vector<8x32xf32> to vector<8x8xf32>
    %215 = arith.truncf %214 : vector<8x8xf32> to vector<8x8xbf16>
    %216 = vector.extract_strided_slice %179 {offsets = [0, 8], sizes = [8, 8], strides = [1, 1]} : vector<8x32xf32> to vector<8x8xf32>
    %217 = arith.truncf %216 : vector<8x8xf32> to vector<8x8xbf16>
    %218 = tpu.transpose %215, [1, 0] : vector<8x8xbf16> -> vector<8x8xbf16>
    %cst_81 = arith.constant dense<0.000000e+00> : vector<8x8xf32>
    %219 = tpu.matmul %213, %218, %cst_81 {dimension_numbers = #tpu.dot_dimension_numbers<[1], [0], [0], [1], [0, 0, 1, 1], [], []>} : vector<8x8xbf16>, vector<8x8xbf16>, vector<8x8xf32> -> vector<8x8xf32>
    %cst_82 = arith.constant 0.353553385 : f32
    %220 = vector.broadcast %cst_82 : f32 to vector<8x8xf32>
    %221 = arith.mulf %219, %220 : vector<8x8xf32>
    %222 = arith.addf %221, %7 : vector<8x8xf32>
    %cst_83 = arith.constant dense<0xFF800000> : vector<8xf32>
    %223 = vector.multi_reduction <maximumf>, %222, %cst_83 [1] : vector<8x8xf32> to vector<8xf32>
    %224 = vector.shape_cast %223 : vector<8xf32> to vector<8x1xf32>
    %225 = vector.broadcast %224 : vector<8x1xf32> to vector<8x8xf32>
    %226 = arith.subf %222, %225 : vector<8x8xf32>
    %227 = math.exp %226 : vector<8x8xf32>
    %cst_84 = arith.constant dense<0.000000e+00> : vector<8xf32>
    %228 = vector.multi_reduction <add>, %227, %cst_84 [1] : vector<8x8xf32> to vector<8xf32>
    %229 = vector.shape_cast %228 : vector<8xf32> to vector<8x1xf32>
    %230 = tpu.reciprocal %229 {approx = true} : vector<8x1xf32> -> vector<8x1xf32>
    %231 = vector.broadcast %230 : vector<8x1xf32> to vector<8x8xf32>
    %232 = arith.mulf %227, %231 : vector<8x8xf32>
    %233 = arith.truncf %232 : vector<8x8xf32> to vector<8x8xbf16>
    %cst_85 = arith.constant dense<0.000000e+00> : vector<8x8xf32>
    %234 = tpu.matmul %233, %217, %cst_85 {dimension_numbers = #tpu.dot_dimension_numbers<[1], [0], [0], [1], [0, 0, 1, 1], [], []>} : vector<8x8xbf16>, vector<8x8xbf16>, vector<8x8xf32> -> vector<8x8xf32>
    %235 = arith.truncf %234 : vector<8x8xf32> to vector<8x8xbf16>
    %236 = vector.extract_strided_slice %180 {offsets = [8, 0], sizes = [8, 32], strides = [1, 1]} : vector<32x32xbf16> to vector<8x32xbf16>
    %cst_86 = arith.constant dense<0.000000e+00> : vector<8x32xf32>
    %237 = tpu.matmul %235, %236, %cst_86 {dimension_numbers = #tpu.dot_dimension_numbers<[1], [0], [0], [1], [0, 0, 1, 1], [], []>} : vector<8x8xbf16>, vector<8x32xbf16>, vector<8x32xf32> -> vector<8x32xf32>
    %238 = arith.addf %211, %237 : vector<8x32xf32>
    %239 = vector.extract_strided_slice %168 {offsets = [0, 16], sizes = [8, 8], strides = [1, 1]} : vector<8x32xf32> to vector<8x8xf32>
    %240 = arith.truncf %239 : vector<8x8xf32> to vector<8x8xbf16>
    %241 = vector.extract_strided_slice %175 {offsets = [0, 16], sizes = [8, 8], strides = [1, 1]} : vector<8x32xf32> to vector<8x8xf32>
    %242 = arith.truncf %241 : vector<8x8xf32> to vector<8x8xbf16>
    %243 = vector.extract_strided_slice %179 {offsets = [0, 16], sizes = [8, 8], strides = [1, 1]} : vector<8x32xf32> to vector<8x8xf32>
    %244 = arith.truncf %243 : vector<8x8xf32> to vector<8x8xbf16>
    %245 = tpu.transpose %242, [1, 0] : vector<8x8xbf16> -> vector<8x8xbf16>
    %cst_87 = arith.constant dense<0.000000e+00> : vector<8x8xf32>
    %246 = tpu.matmul %240, %245, %cst_87 {dimension_numbers = #tpu.dot_dimension_numbers<[1], [0], [0], [1], [0, 0, 1, 1], [], []>} : vector<8x8xbf16>, vector<8x8xbf16>, vector<8x8xf32> -> vector<8x8xf32>
    %cst_88 = arith.constant 0.353553385 : f32
    %247 = vector.broadcast %cst_88 : f32 to vector<8x8xf32>
    %248 = arith.mulf %246, %247 : vector<8x8xf32>
    %249 = arith.addf %248, %7 : vector<8x8xf32>
    %cst_89 = arith.constant dense<0xFF800000> : vector<8xf32>
    %250 = vector.multi_reduction <maximumf>, %249, %cst_89 [1] : vector<8x8xf32> to vector<8xf32>
    %251 = vector.shape_cast %250 : vector<8xf32> to vector<8x1xf32>
    %252 = vector.broadcast %251 : vector<8x1xf32> to vector<8x8xf32>
    %253 = arith.subf %249, %252 : vector<8x8xf32>
    %254 = math.exp %253 : vector<8x8xf32>
    %cst_90 = arith.constant dense<0.000000e+00> : vector<8xf32>
    %255 = vector.multi_reduction <add>, %254, %cst_90 [1] : vector<8x8xf32> to vector<8xf32>
    %256 = vector.shape_cast %255 : vector<8xf32> to vector<8x1xf32>
    %257 = tpu.reciprocal %256 {approx = true} : vector<8x1xf32> -> vector<8x1xf32>
    %258 = vector.broadcast %257 : vector<8x1xf32> to vector<8x8xf32>
    %259 = arith.mulf %254, %258 : vector<8x8xf32>
    %260 = arith.truncf %259 : vector<8x8xf32> to vector<8x8xbf16>
    %cst_91 = arith.constant dense<0.000000e+00> : vector<8x8xf32>
    %261 = tpu.matmul %260, %244, %cst_91 {dimension_numbers = #tpu.dot_dimension_numbers<[1], [0], [0], [1], [0, 0, 1, 1], [], []>} : vector<8x8xbf16>, vector<8x8xbf16>, vector<8x8xf32> -> vector<8x8xf32>
    %262 = arith.truncf %261 : vector<8x8xf32> to vector<8x8xbf16>
    %263 = vector.extract_strided_slice %180 {offsets = [16, 0], sizes = [8, 32], strides = [1, 1]} : vector<32x32xbf16> to vector<8x32xbf16>
    %cst_92 = arith.constant dense<0.000000e+00> : vector<8x32xf32>
    %264 = tpu.matmul %262, %263, %cst_92 {dimension_numbers = #tpu.dot_dimension_numbers<[1], [0], [0], [1], [0, 0, 1, 1], [], []>} : vector<8x8xbf16>, vector<8x32xbf16>, vector<8x32xf32> -> vector<8x32xf32>
    %265 = arith.addf %238, %264 : vector<8x32xf32>
    %266 = vector.extract_strided_slice %168 {offsets = [0, 24], sizes = [8, 8], strides = [1, 1]} : vector<8x32xf32> to vector<8x8xf32>
    %267 = arith.truncf %266 : vector<8x8xf32> to vector<8x8xbf16>
    %268 = vector.extract_strided_slice %175 {offsets = [0, 24], sizes = [8, 8], strides = [1, 1]} : vector<8x32xf32> to vector<8x8xf32>
    %269 = arith.truncf %268 : vector<8x8xf32> to vector<8x8xbf16>
    %270 = vector.extract_strided_slice %179 {offsets = [0, 24], sizes = [8, 8], strides = [1, 1]} : vector<8x32xf32> to vector<8x8xf32>
    %271 = arith.truncf %270 : vector<8x8xf32> to vector<8x8xbf16>
    %272 = tpu.transpose %269, [1, 0] : vector<8x8xbf16> -> vector<8x8xbf16>
    %cst_93 = arith.constant dense<0.000000e+00> : vector<8x8xf32>
    %273 = tpu.matmul %267, %272, %cst_93 {dimension_numbers = #tpu.dot_dimension_numbers<[1], [0], [0], [1], [0, 0, 1, 1], [], []>} : vector<8x8xbf16>, vector<8x8xbf16>, vector<8x8xf32> -> vector<8x8xf32>
    %cst_94 = arith.constant 0.353553385 : f32
    %274 = vector.broadcast %cst_94 : f32 to vector<8x8xf32>
    %275 = arith.mulf %273, %274 : vector<8x8xf32>
    %276 = arith.addf %275, %7 : vector<8x8xf32>
    %cst_95 = arith.constant dense<0xFF800000> : vector<8xf32>
    %277 = vector.multi_reduction <maximumf>, %276, %cst_95 [1] : vector<8x8xf32> to vector<8xf32>
    %278 = vector.shape_cast %277 : vector<8xf32> to vector<8x1xf32>
    %279 = vector.broadcast %278 : vector<8x1xf32> to vector<8x8xf32>
    %280 = arith.subf %276, %279 : vector<8x8xf32>
    %281 = math.exp %280 : vector<8x8xf32>
    %cst_96 = arith.constant dense<0.000000e+00> : vector<8xf32>
    %282 = vector.multi_reduction <add>, %281, %cst_96 [1] : vector<8x8xf32> to vector<8xf32>
    %283 = vector.shape_cast %282 : vector<8xf32> to vector<8x1xf32>
    %284 = tpu.reciprocal %283 {approx = true} : vector<8x1xf32> -> vector<8x1xf32>
    %285 = vector.broadcast %284 : vector<8x1xf32> to vector<8x8xf32>
    %286 = arith.mulf %281, %285 : vector<8x8xf32>
    %287 = arith.truncf %286 : vector<8x8xf32> to vector<8x8xbf16>
    %cst_97 = arith.constant dense<0.000000e+00> : vector<8x8xf32>
    %288 = tpu.matmul %287, %271, %cst_97 {dimension_numbers = #tpu.dot_dimension_numbers<[1], [0], [0], [1], [0, 0, 1, 1], [], []>} : vector<8x8xbf16>, vector<8x8xbf16>, vector<8x8xf32> -> vector<8x8xf32>
    %289 = arith.truncf %288 : vector<8x8xf32> to vector<8x8xbf16>
    %290 = vector.extract_strided_slice %180 {offsets = [24, 0], sizes = [8, 32], strides = [1, 1]} : vector<32x32xbf16> to vector<8x32xbf16>
    %cst_98 = arith.constant dense<0.000000e+00> : vector<8x32xf32>
    %291 = tpu.matmul %289, %290, %cst_98 {dimension_numbers = #tpu.dot_dimension_numbers<[1], [0], [0], [1], [0, 0, 1, 1], [], []>} : vector<8x8xbf16>, vector<8x32xbf16>, vector<8x32xf32> -> vector<8x32xf32>
    %292 = arith.addf %265, %291 : vector<8x32xf32>
    %293 = arith.addf %162, %292 : vector<8x32xf32>
    %c1_99 = arith.constant 1 : index
    %c0_100 = arith.constant 0 : index
    %294 = vector.load %arg19[%c1_99, %c0_100] : memref<3x32xf32, #tpu.memory_space<vmem>>, vector<1x32xf32>
    %c1_101 = arith.constant 1 : index
    %c0_102 = arith.constant 0 : index
    %295 = vector.load %arg20[%c1_101, %c0_102] : memref<3x32xf32, #tpu.memory_space<vmem>>, vector<1x32xf32>
    %cst_103 = arith.constant dense<0.000000e+00> : vector<8xf32>
    %296 = vector.multi_reduction <add>, %293, %cst_103 [1] : vector<8x32xf32> to vector<8xf32>
    %297 = vector.shape_cast %296 : vector<8xf32> to vector<8x1xf32>
    %cst_104 = arith.constant 3.200000e+01 : f32
    %298 = vector.broadcast %cst_104 : f32 to vector<8x1xf32>
    %299 = arith.divf %297, %298 : vector<8x1xf32>
    %300 = vector.broadcast %299 : vector<8x1xf32> to vector<8x32xf32>
    %301 = arith.subf %293, %300 : vector<8x32xf32>
    %302 = arith.mulf %301, %301 : vector<8x32xf32>
    %cst_105 = arith.constant dense<0.000000e+00> : vector<8xf32>
    %303 = vector.multi_reduction <add>, %302, %cst_105 [1] : vector<8x32xf32> to vector<8xf32>
    %304 = vector.shape_cast %303 : vector<8xf32> to vector<8x1xf32>
    %cst_106 = arith.constant 3.200000e+01 : f32
    %305 = vector.broadcast %cst_106 : f32 to vector<8x1xf32>
    %306 = arith.divf %304, %305 : vector<8x1xf32>
    %307 = vector.broadcast %299 : vector<8x1xf32> to vector<8x32xf32>
    %308 = arith.subf %293, %307 : vector<8x32xf32>
    %cst_107 = arith.constant 9.99999974E-6 : f32
    %309 = vector.broadcast %cst_107 : f32 to vector<8x1xf32>
    %310 = arith.addf %306, %309 : vector<8x1xf32>
    %311 = math.rsqrt %310 : vector<8x1xf32>
    %312 = vector.broadcast %311 : vector<8x1xf32> to vector<8x32xf32>
    %313 = arith.mulf %308, %312 : vector<8x32xf32>
    %314 = vector.broadcast %294 : vector<1x32xf32> to vector<8x32xf32>
    %315 = arith.mulf %313, %314 : vector<8x32xf32>
    %316 = vector.broadcast %295 : vector<1x32xf32> to vector<8x32xf32>
    %317 = arith.addf %315, %316 : vector<8x32xf32>
    %318 = arith.truncf %317 : vector<8x32xf32> to vector<8x32xbf16>
    %c0_108 = arith.constant 0 : index
    %c0_109 = arith.constant 0 : index
    %319 = vector.load %arg15[%c0_108, %c0_109] : memref<32x64xbf16, #tpu.memory_space<vmem>>, vector<32x64xbf16>
    %cst_110 = arith.constant dense<0.000000e+00> : vector<8x64xf32>
    %320 = tpu.matmul %318, %319, %cst_110 {dimension_numbers = #tpu.dot_dimension_numbers<[1], [0], [0], [1], [0, 0, 1, 1], [], []>} : vector<8x32xbf16>, vector<32x64xbf16>, vector<8x64xf32> -> vector<8x64xf32>
    %c0_111 = arith.constant 0 : index
    %c0_112 = arith.constant 0 : index
    %321 = vector.load %arg16[%c0_111, %c0_112] : memref<1x64xf32, #tpu.memory_space<vmem>>, vector<1x64xf32>
    %322 = vector.broadcast %321 : vector<1x64xf32> to vector<8x64xf32>
    %323 = arith.addf %320, %322 : vector<8x64xf32>
    %cst_113 = arith.constant 0.000000e+00 : f32
    %324 = vector.broadcast %cst_113 : f32 to vector<8x64xf32>
    %325 = arith.maximumf %323, %324 : vector<8x64xf32>
    %326 = arith.truncf %325 : vector<8x64xf32> to vector<8x64xbf16>
    %c0_114 = arith.constant 0 : index
    %c0_115 = arith.constant 0 : index
    %327 = vector.load %arg17[%c0_114, %c0_115] : memref<64x32xbf16, #tpu.memory_space<vmem>>, vector<64x32xbf16>
    %cst_116 = arith.constant dense<0.000000e+00> : vector<8x32xf32>
    %328 = tpu.matmul %326, %327, %cst_116 {dimension_numbers = #tpu.dot_dimension_numbers<[1], [0], [0], [1], [0, 0, 1, 1], [], []>} : vector<8x64xbf16>, vector<64x32xbf16>, vector<8x32xf32> -> vector<8x32xf32>
    %c0_117 = arith.constant 0 : index
    %c0_118 = arith.constant 0 : index
    %329 = vector.load %arg18[%c0_117, %c0_118] : memref<1x32xf32, #tpu.memory_space<vmem>>, vector<1x32xf32>
    %330 = vector.broadcast %329 : vector<1x32xf32> to vector<8x32xf32>
    %331 = arith.addf %328, %330 : vector<8x32xf32>
    %332 = arith.addf %317, %331 : vector<8x32xf32>
    %c2_119 = arith.constant 2 : index
    %c0_120 = arith.constant 0 : index
    %333 = vector.load %arg19[%c2_119, %c0_120] : memref<3x32xf32, #tpu.memory_space<vmem>>, vector<1x32xf32>
    %c2_121 = arith.constant 2 : index
    %c0_122 = arith.constant 0 : index
    %334 = vector.load %arg20[%c2_121, %c0_122] : memref<3x32xf32, #tpu.memory_space<vmem>>, vector<1x32xf32>
    %cst_123 = arith.constant dense<0.000000e+00> : vector<8xf32>
    %335 = vector.multi_reduction <add>, %332, %cst_123 [1] : vector<8x32xf32> to vector<8xf32>
    %336 = vector.shape_cast %335 : vector<8xf32> to vector<8x1xf32>
    %cst_124 = arith.constant 3.200000e+01 : f32
    %337 = vector.broadcast %cst_124 : f32 to vector<8x1xf32>
    %338 = arith.divf %336, %337 : vector<8x1xf32>
    %339 = vector.broadcast %338 : vector<8x1xf32> to vector<8x32xf32>
    %340 = arith.subf %332, %339 : vector<8x32xf32>
    %341 = arith.mulf %340, %340 : vector<8x32xf32>
    %cst_125 = arith.constant dense<0.000000e+00> : vector<8xf32>
    %342 = vector.multi_reduction <add>, %341, %cst_125 [1] : vector<8x32xf32> to vector<8xf32>
    %343 = vector.shape_cast %342 : vector<8xf32> to vector<8x1xf32>
    %cst_126 = arith.constant 3.200000e+01 : f32
    %344 = vector.broadcast %cst_126 : f32 to vector<8x1xf32>
    %345 = arith.divf %343, %344 : vector<8x1xf32>
    %346 = vector.broadcast %338 : vector<8x1xf32> to vector<8x32xf32>
    %347 = arith.subf %332, %346 : vector<8x32xf32>
    %cst_127 = arith.constant 9.99999974E-6 : f32
    %348 = vector.broadcast %cst_127 : f32 to vector<8x1xf32>
    %349 = arith.addf %345, %348 : vector<8x1xf32>
    %350 = math.rsqrt %349 : vector<8x1xf32>
    %351 = vector.broadcast %350 : vector<8x1xf32> to vector<8x32xf32>
    %352 = arith.mulf %347, %351 : vector<8x32xf32>
    %353 = vector.broadcast %333 : vector<1x32xf32> to vector<8x32xf32>
    %354 = arith.mulf %352, %353 : vector<8x32xf32>
    %355 = vector.broadcast %334 : vector<1x32xf32> to vector<8x32xf32>
    %356 = arith.addf %354, %355 : vector<8x32xf32>
    %c0_128 = arith.constant 0 : index
    %c0_129 = arith.constant 0 : index
    %c0_130 = arith.constant 0 : index
    %357 = vector.load %arg21[%c0_128, %c0_129, %c0_130] : memref<1x8x32xf32, #tpu.memory_space<vmem>>, vector<1x8x32xf32>
    %358 = vector.shape_cast %357 : vector<1x8x32xf32> to vector<8x32xf32>
    %359 = vector.shape_cast %356 : vector<8x32xf32> to vector<1x8x32xf32>
    tpu.vector_store %arg21[%c0_128, %c0_129, %c0_130], %359 {strides = array<i32>} : memref<1x8x32xf32, #tpu.memory_space<vmem>>, vector<1x8x32xf32>,
    return
  }
  func.func @transform_0(%arg0: i32, %arg1: i32) -> (i32, i32, i32) {
    %c0_i32 = arith.constant 0 : i32
    %c0_i32_0 = arith.constant 0 : i32
    return %arg0, %arg1, %c0_i32 : i32, i32, i32
  }
  func.func @transform_1(%arg0: i32, %arg1: i32) -> (i32, i32, i32) {
    %c0_i32 = arith.constant 0 : i32
    %c0_i32_0 = arith.constant 0 : i32
    %c0_i32_1 = arith.constant 0 : i32
    return %arg0, %c0_i32, %c0_i32_0 : i32, i32, i32
  }
  func.func @transform_2(%arg0: i32, %arg1: i32) -> (i32, i32, i32) {
    %c0_i32 = arith.constant 0 : i32
    %c0_i32_0 = arith.constant 0 : i32
    %c0_i32_1 = arith.constant 0 : i32
    return %arg0, %c0_i32, %c0_i32_0 : i32, i32, i32
  }
  func.func @transform_3(%arg0: i32, %arg1: i32) -> (i32, i32) {
    %c0_i32 = arith.constant 0 : i32
    %c0_i32_0 = arith.constant 0 : i32
    return %arg1, %c0_i32 : i32, i32
  }
  func.func @transform_4(%arg0: i32, %arg1: i32) -> (i32, i32) {
    %c0_i32 = arith.constant 0 : i32
    %c0_i32_0 = arith.constant 0 : i32
    return %arg1, %c0_i32 : i32, i32
  }
  func.func @transform_5(%arg0: i32, %arg1: i32) -> (i32, i32) {
    %c0_i32 = arith.constant 0 : i32
    %c0_i32_0 = arith.constant 0 : i32
    %c0_i32_1 = arith.constant 0 : i32
    return %c0_i32, %c0_i32_0 : i32, i32
  }
  func.func @transform_6(%arg0: i32, %arg1: i32) -> (i32, i32) {
    %c0_i32 = arith.constant 0 : i32
    %c0_i32_0 = arith.constant 0 : i32
    %c0_i32_1 = arith.constant 0 : i32
    return %c0_i32, %c0_i32_0 : i32, i32
  }
  func.func @transform_7(%arg0: i32, %arg1: i32) -> (i32, i32) {
    %c0_i32 = arith.constant 0 : i32
    %c0_i32_0 = arith.constant 0 : i32
    %c0_i32_1 = arith.constant 0 : i32
    return %c0_i32, %c0_i32_0 : i32, i32
  }
  func.func @transform_8(%arg0: i32, %arg1: i32) -> (i32, i32) {
    %c0_i32 = arith.constant 0 : i32
    %c0_i32_0 = arith.constant 0 : i32
    %c0_i32_1 = arith.constant 0 : i32
    return %c0_i32, %c0_i32_0 : i32, i32
  }
  func.func @transform_9(%arg0: i32, %arg1: i32) -> (i32, i32) {
    %c0_i32 = arith.constant 0 : i32
    %c0_i32_0 = arith.constant 0 : i32
    %c0_i32_1 = arith.constant 0 : i32
    return %c0_i32, %c0_i32_0 : i32, i32
  }
  func.func @transform_10(%arg0: i32, %arg1: i32) -> (i32, i32) {
    %c0_i32 = arith.constant 0 : i32
    %c0_i32_0 = arith.constant 0 : i32
    %c0_i32_1 = arith.constant 0 : i32
    return %c0_i32, %c0_i32_0 : i32, i32
  }
  func.func @transform_11(%arg0: i32, %arg1: i32) -> (i32, i32) {
    %c0_i32 = arith.constant 0 : i32
    %c0_i32_0 = arith.constant 0 : i32
    %c0_i32_1 = arith.constant 0 : i32
    return %c0_i32, %c0_i32_0 : i32, i32
  }
  func.func @transform_12(%arg0: i32, %arg1: i32) -> (i32, i32) {
    %c0_i32 = arith.constant 0 : i32
    %c0_i32_0 = arith.constant 0 : i32
    %c0_i32_1 = arith.constant 0 : i32
    return %c0_i32, %c0_i32_0 : i32, i32
  }
  func.func @transform_13(%arg0: i32, %arg1: i32) -> (i32, i32) {
    %c0_i32 = arith.constant 0 : i32
    %c0_i32_0 = arith.constant 0 : i32
    %c0_i32_1 = arith.constant 0 : i32
    return %c0_i32, %c0_i32_0 : i32, i32
  }
  func.func @transform_14(%arg0: i32, %arg1: i32) -> (i32, i32) {
    %c0_i32 = arith.constant 0 : i32
    %c0_i32_0 = arith.constant 0 : i32
    %c0_i32_1 = arith.constant 0 : i32
    return %c0_i32, %c0_i32_0 : i32, i32
  }
  func.func @transform_15(%arg0: i32, %arg1: i32) -> (i32, i32) {
    %c0_i32 = arith.constant 0 : i32
    %c0_i32_0 = arith.constant 0 : i32
    %c0_i32_1 = arith.constant 0 : i32
    return %c0_i32, %c0_i32_0 : i32, i32
  }
  func.func @transform_16(%arg0: i32, %arg1: i32) -> (i32, i32) {
    %c0_i32 = arith.constant 0 : i32
    %c0_i32_0 = arith.constant 0 : i32
    %c0_i32_1 = arith.constant 0 : i32
    return %c0_i32, %c0_i32_0 : i32, i32
  }
  func.func @transform_17(%arg0: i32, %arg1: i32) -> (i32, i32) {
    %c0_i32 = arith.constant 0 : i32
    %c0_i32_0 = arith.constant 0 : i32
    %c0_i32_1 = arith.constant 0 : i32
    return %c0_i32, %c0_i32_0 : i32, i32
  }
  func.func @transform_18(%arg0: i32, %arg1: i32) -> (i32, i32) {
    %c0_i32 = arith.constant 0 : i32
    %c0_i32_0 = arith.constant 0 : i32
    %c0_i32_1 = arith.constant 0 : i32
    return %c0_i32, %c0_i32_0 : i32, i32
  }
  func.func @transform_19(%arg0: i32, %arg1: i32) -> (i32, i32, i32) {
    %c0_i32 = arith.constant 0 : i32
    %c0_i32_0 = arith.constant 0 : i32
    return %arg0, %arg1, %c0_i32 : i32, i32, i32
  }
}

</mosaic_0001>

<bundles_post_ra>
// kernel: tpu_custom_call.1
= control target key start
LH: loop header
LB: loop body
LE: loop exit
PB: predicated region body
PF: predicated region fallthrough
CT: control target
= control target key end

     0   :  { %s4461_s0 = inlined_call_operand.vmem [shape: f32[2,8,32], index: 0, kind: input, shape index: {}]   ;;  %s4462_s1 = inlined_call_operand.vmem [shape: f32[2,8,32], index: 1, kind: input, shape index: {}]   ;;  %s4463_s2 = inlined_call_operand.vmem [shape: f32[2,8,32], index: 2, kind: input, shape index: {}]   ;;  %s4464_s3 = inlined_call_operand.hbm [shape: f32[8,8], index: 3, kind: input, shape index: {}]   ;;  %s4465_s4 = inlined_call_operand.hbm [shape: f32[8,8], index: 4, kind: input, shape index: {}]   ;;  %s4466_s5 = inlined_call_operand.hbm [shape: bf16[32,32], index: 5, kind: input, shape index: {}]   ;;  %s4467_s6 = inlined_call_operand.hbm [shape: bf16[32,64], index: 6, kind: input, shape index: {}]   ;;  %s4468_s7 = inlined_call_operand.hbm [shape: bf16[32,32], index: 7, kind: input, shape index: {}]   ;;  %s4469_s8 = inlined_call_operand.hbm [shape: f32[4,32], index: 8, kind: input, shape index: {}]   ;;  %s4470_s9 = inlined_call_operand.vmem [shape: bf16[32,32], index: 9, kind: input, shape index: {}]   ;;  %s4471_s10 = inlined_call_operand.hbm [shape: bf16[32,64], index: 10, kind: input, shape index: {}]   ;;  %s4472_s11 = inlined_call_operand.hbm [shape: bf16[32,32], index: 11, kind: input, shape index: {}]   ;;  %s4473_s12 = inlined_call_operand.vmem [shape: f32[4,32], index: 12, kind: input, shape index: {}]   ;;  %s4474_s13 = inlined_call_operand.hbm [shape: bf16[32,64], index: 13, kind: input, shape index: {}]   ;;  %s4475_s14 = inlined_call_operand.vmem [shape: f32[1,64], index: 14, kind: input, shape index: {}]   ;;  %s4476_s15 = inlined_call_operand.vmem [shape: bf16[64,32], index: 15, kind: input, shape index: {}]   ;;  %s4477_s16 = inlined_call_operand.hbm [shape: f32[1,32], index: 16, kind: input, shape index: {}]   ;;  %s4478_s17 = inlined_call_operand.vmem [shape: f32[3,32], index: 17, kind: input, shape index: {}]   ;;  %s4479_s18 = inlined_call_operand.vmem [shape: f32[3,32], index: 18, kind: input, shape index: {}]   ;;  %s4480_s19 = inlined_call_operand.hbm [shape: f32[2,8,32], index: 19, kind: output, shape index: {}]  }
   0x1   :  { %4498 = sst [smem:[#allocation35_spill]] %s4461_s0 }
   0x2   :  { %4499 = sst [smem:[#allocation36_spill]] %s4462_s1 }
   0x3   :  { %4500 = sst [smem:[#allocation37_spill]] %s4463_s2 }
   0x4   :  { %4501 = sst [smem:[#allocation38_spill]] %s4464_s3 }
   0x5   :  { %4502 = sst [smem:[#allocation39_spill]] %s4465_s4 }
   0x6   :  { %4503 = sst [smem:[#allocation40_spill]] %s4480_s19 }
   0x7   :  { %24 = vsyncpa [#allocation3], 0 }
   0x8   :  { %25 = vsyncpa [#allocation6], 0 }
   0x9   :  { %26 = vsyncpa [#allocation9], 0 }
   0xa   :  { %27 = vsyncpa [#allocation12], 0 }
   0xb   :  { %28 = vsyncpa [#allocation15], 0 }
   0xc   :  { %29 = vsyncpa [#allocation18], 0 }
   0xd   :  { %30 = vsyncpa [#allocation4], 0 }
   0xe   :  { %32 = vsyncpa [#allocation4 + $0x1], 0  ;;  %s3910_s0 = smov 0   ;;  %s3912_s30 = smov 0  }
   0xf   :  { %s3914_s20 = smov 0   ;;  %s3916_s21 = smov 0  }
  0x10   :  { %s3918_s1 = smov 0   ;;  %s3920_s22 = smov 0  }
  0x11 LB: > { %4504 = sst [smem:[#allocation27_spill]] %s3765_s0  ;;  %s2848_s2 = sadd.s32 4294967295, %s3785_s22   ;;  %s3785_s22 = sphi %s3920_s22, %s38_s22   ;;  %s3781_s1 = sphi %s3918_s1, %s4537_s1   ;;  %s3777_s21 = sphi %s3916_s21, %s4536_s21   ;;  %s3773_s20 = sphi %s3914_s20, %s4540_s20   ;;  %s3769_s30 = sphi %s3912_s30, %s4539_s30   ;;  %s3765_s0 = sphi %s3910_s0, %s4538_s0  }
  0x12   : > { %4505 = sst [smem:[#allocation28_spill]] %s3773_s20  ;;  %s2849_s23 = sadd.s32 4294967294, %s3785_s22  }
  0x13   : > { %4506 = sst [smem:[#allocation29_spill]] %s3781_s1  ;;  %s50_s24 = sadd.s32 1, %s3781_s1 }
  0x14   : > { %4507 = sst [smem:[#allocation30_spill]] %s3785_s22  ;;  %s485_s25 = sadd.s32 1, %s3773_s20 }
  0x15   : > { %p52_p0 = scmp.ge.s32.totalorder %s50_s24, 2  ;;  %p495_p1 = scmp.ne.s32.totalorder %s3773_s20, %s3769_s30 }
  0x16   : > { %p496_p2 = scmp.eq.s32.totalorder %s2848_s2, 1  ;;  %p501_p3 = scmp.ne.s32.totalorder %s3769_s30, %s3765_s0 }
  0x17   : > { %s4542_s24 = smov (%p52_p0, %s50_s24), 0  ;;  %p502_p5 = scmp.eq.s32.totalorder %s2849_s23, 1 }
  0x18   : > { %4508 = sst [smem:[#allocation31_spill]] %s4542_s24  ;;  %p3950_p4 = por %p496_p2, %p495_p1 }
  0x19   : > { %s480_s26 = ssub.s32 %s3781_s1, %s4542_s24  ;;  %p2850_p6 = scmp.ge.s32.totalorder %s3785_s22, 1 }
  0x1a   : > { %s4509_s3 = scalar_select %p3950_p4, 1, 0 }
  0x1b   : > { %p483_p7 = scmp.eq.s32.totalorder %s480_s26, 0  ;;  %p3957_p8 = por %p502_p5, %p501_p3 }
  0x1c   : > { %4510 = sst [smem:[#allocation32_spill]] %s4509_s3  ;;  %p509_p9 = scmp.lt.s32.totalorder %s3785_s22, 3 }
  0x1d   : > { %s4511_s27 = scalar_select %p3957_p8, 1, 0 }
  0x1e   : > { %s3963_s28 = scalar_select %p483_p7, %s3773_s20, %s485_s25  }
  0x1f   : > { %4512 = sst [smem:[#allocation33_spill]] %s4511_s27  ;;  %p3965_p10 = pnand %p2850_p6, %p509_p9 }
  0x20   : > { %4513 = sst [smem:[#allocation34_spill]] %s3963_s28  ;;  %p3969_p11 = scmp.eq.s32.totalorder %s2848_s2, 0 }
  0x21   : > { %s4514_s29 = scalar_select %p3965_p10, 1, 0 }
  0x22   : > { %s4515_s0 = scalar_select %p3969_p11, 1, 0 }
  0x23   : > { %p3247_p12 = pneg %p3965_p10  ;;  %s3787_s23 = smov [#allocation5]  }
  0x24   : > { %s537_s26 = sshll.u32 %s3787_s23, 4  ;;  %s3788_s25 = smov [#allocation8]   ;;  %s538_s26 = int_to_ptr.vmem [resolvable:$true] %s537_s26 }
  0x25   : > { %p3977_p13 = pnand %p3969_p11, %p3247_p12  ;;  %s560_s1 = sshll.u32 %s3788_s25, 4  ;;  %s561_s1 = int_to_ptr.vmem [resolvable:$true] %s560_s1 }
  0x26   : > { %s3436_s28 = scalar_lea.vmem %s538_s26, 128  ;;  %p3444_p5 = scmp.lt.s32.totalorder %s538_s26, %s538_s26 }
  0x27   : > { %p3983_p0 = pneg %p3977_p13  ;;  %p3437_p1 = scmp.ne.s32.totalorder %s538_s26, %s3436_s28 }
  0x28   : > { %p3445_p6 = scmp.lt.s32.totalorder %s3436_s28, %s3436_s28 }
  0x29   : > { %p3439_p2 = pnand %p3437_p1, %p3983_p0 }
  0x2a   : > { %p3446_p7 = por %p3445_p6, %p3444_p5 }
  0x2b   : > { %p3440_p3 = pneg %p3439_p2 }
  0x2d   : > { %p3447_p9 = pnand %p3446_p7, %p3440_p3 }
  0x2f   : > { %3450 = shalt.err (!%p3447_p9)
}
  0x30   : > { %s4518_s4 = sld [smem:[#allocation39_spill]]  ;;  %s3462_s20 = scalar_lea.vmem %s561_s1, 256 }
  0x31   : > { %p3463_p12 = scmp.ne.s32.totalorder %s561_s1, %s3462_s20  ;;  %p3470_p11 = scmp.lt.s32.totalorder %s561_s1, %s561_s1 }
  0x32   : > { %p3471_p1 = scmp.lt.s32.totalorder %s3462_s20, %s3462_s20 }
  0x33   : > { %p3465_p8 = pnand %p3463_p12, %p3983_p0 }
  0x34   : > { %p3472_p2 = por %p3471_p1, %p3470_p11 }
  0x35   : > { %p3466_p4 = pneg %p3465_p8 }
  0x36   : > { %3253 = dma.hbm_to_vmem [thread:$0]  (!%p3977_p13), %s4518_s4, 128, %s538_s26, [#allocation6]  }
  0x37   : > { %p3473_p10 = pnand %p3472_p2, %p3466_p4 }
  0x39   : > { %3476 = shalt.err (!%p3473_p10)
}
  0x3a   : > { %s3789_s28 = smov 64   ;;  %s3790_s27 = smov 4  }
  0x3b   : > { %3259 = dma.hbm_to_vmem [thread:$0]  (!%p3977_p13), %s4467_s6, 256, %s561_s1, [#allocation9], %s3789_s28, %s3789_s28, %s3790_s27  }
  0x3c   : > { %s3791_s25 = smov [#allocation11]   ;;  %s3792_s22 = smov [#allocation14]  }
  0x3d   : > { %s587_s4 = sshll.u32 %s3791_s25, 4  ;;  %s613_s20 = sshll.u32 %s3792_s22, 4  ;;  %s588_s4 = int_to_ptr.vmem [resolvable:$true] %s587_s4  ;;  %s614_s20 = int_to_ptr.vmem [resolvable:$true] %s613_s20 }
  0x3e   : > { %s3488_s19 = scalar_lea.vmem %s588_s4, 64  ;;  %p3496_p11 = scmp.lt.s32.totalorder %s588_s4, %s588_s4 }
  0x3f   : > { %p3489_p4 = scmp.ne.s32.totalorder %s588_s4, %s3488_s19  ;;  %p3497_p3 = scmp.lt.s32.totalorder %s3488_s19, %s3488_s19 }
  0x41   : > { %p3491_p8 = pnand %p3489_p4, %p3983_p0  ;;  %p3498_p5 = por %p3497_p3, %p3496_p11 }
  0x43   : > { %p3492_p10 = pneg %p3491_p8 }
  0x45   : > { %p3499_p6 = pnand %p3498_p5, %p3492_p10 }
  0x47   : > { %3502 = shalt.err (!%p3499_p6)
}
  0x48   : > { %3265 = dma.hbm_to_vmem [thread:$0]  (!%p3977_p13), %s4469_s8, 64, %s588_s4, [#allocation12]  }
  0x49   : > { %s3514_s1 = scalar_lea.vmem %s614_s20, 256  ;;  %p3522_p1 = scmp.lt.s32.totalorder %s614_s20, %s614_s20 }
  0x4a   : > { %p3515_p7 = scmp.ne.s32.totalorder %s614_s20, %s3514_s1  ;;  %p3523_p2 = scmp.lt.s32.totalorder %s3514_s1, %s3514_s1 }
  0x4c   : > { %p3517_p9 = pnand %p3515_p7, %p3983_p0  ;;  %p3524_p4 = por %p3523_p2, %p3522_p1 }
  0x4e   : > { %p3518_p12 = pneg %p3517_p9 }
  0x50   : > { %p3525_p8 = pnand %p3524_p4, %p3518_p12 }
  0x52   : > { %3528 = shalt.err (!%p3525_p8)
}
  0x53   : > { %3271 = dma.hbm_to_vmem [thread:$0]  (!%p3977_p13), %s4472_s11, 256, %s614_s20, [#allocation15], %s3789_s28, %s3789_s28, %s3790_s27  }
  0x54   : > { %s3793_s4 = smov [#allocation2]   ;;  %s3794_s26 = smov [#allocation7]  }
  0x55   : > { %s524_s3 = sshll.u32 %s3793_s4, 4  ;;  %s547_s25 = sshll.u32 %s3794_s26, 4  ;;  %s525_s3 = int_to_ptr.vmem [resolvable:$true] %s524_s3  ;;  %s548_s25 = int_to_ptr.vmem [resolvable:$true] %s547_s25 }
  0x56   : > { %s3540_s23 = scalar_lea.vmem %s525_s3, 128  ;;  %p3548_p5 = scmp.lt.s32.totalorder %s525_s3, %s525_s3 }
  0x57   : > { %p3541_p10 = scmp.ne.s32.totalorder %s525_s3, %s3540_s23  ;;  %p3549_p6 = scmp.lt.s32.totalorder %s3540_s23, %s3540_s23 }
  0x59   : > { %p3543_p11 = pnand %p3541_p10, %p3983_p0  ;;  %p3550_p7 = por %p3549_p6, %p3548_p5 }
  0x5b   : > { %p3544_p3 = pneg %p3543_p11 }
  0x5d   : > { %p3551_p9 = pnand %p3550_p7, %p3544_p3 }
  0x5f   : > { %3554 = shalt.err (!%p3551_p9)
}
  0x60   : > { %s4519_s20 = sld [smem:[#allocation38_spill]]  ;;  %s3566_s22 = scalar_lea.vmem %s548_s25, 256 }
  0x61   : > { %p3567_p12 = scmp.ne.s32.totalorder %s548_s25, %s3566_s22  ;;  %p3574_p4 = scmp.lt.s32.totalorder %s548_s25, %s548_s25 }
  0x62   : > { %p3575_p8 = scmp.lt.s32.totalorder %s3566_s22, %s3566_s22 }
  0x63   : > { %p3569_p1 = pnand %p3567_p12, %p3983_p0 }
  0x64   : > { %p3576_p10 = por %p3575_p8, %p3574_p4 }
  0x65   : > { %p3570_p2 = pneg %p3569_p1 }
  0x66   : > { %3250 = dma.hbm_to_vmem [thread:$0]  (!%p3977_p13), %s4519_s20, 128, %s525_s3, [#allocation3]  }
  0x67   : > { %p3577_p11 = pnand %p3576_p10, %p3570_p2 }
  0x69   : > { %3580 = shalt.err (!%p3577_p11)
}
  0x6a   : > { %3256 = dma.hbm_to_vmem [thread:$0]  (!%p3977_p13), %s4466_s5, 256, %s548_s25, [#allocation6], %s3789_s28, %s3789_s28, %s3790_s27  }
  0x6b   : > { %s3795_s3 = smov [#allocation10]   ;;  %s3796_s1 = smov [#allocation13]  }
  0x6c   : > { %s573_s23 = sshll.u32 %s3795_s3, 4  ;;  %s600_s19 = sshll.u32 %s3796_s1, 4  ;;  %s574_s23 = int_to_ptr.vmem [resolvable:$true] %s573_s23  ;;  %s601_s19 = int_to_ptr.vmem [resolvable:$true] %s600_s19 }
  0x6d   : > { %s3592_s20 = scalar_lea.vmem %s574_s23, 256  ;;  %p3600_p7 = scmp.lt.s32.totalorder %s574_s23, %s574_s23 }
  0x6e   : > { %p3593_p3 = scmp.ne.s32.totalorder %s574_s23, %s3592_s20  ;;  %p3601_p9 = scmp.lt.s32.totalorder %s3592_s20, %s3592_s20 }
  0x70   : > { %p3595_p5 = pnand %p3593_p3, %p3983_p0  ;;  %p3602_p12 = por %p3601_p9, %p3600_p7 }
  0x72   : > { %p3596_p6 = pneg %p3595_p5 }
  0x74   : > { %p3603_p1 = pnand %p3602_p12, %p3596_p6 }
  0x76   : > { %3606 = shalt.err (!%p3603_p1)
}
  0x77   : > { %3262 = dma.hbm_to_vmem [thread:$0]  (!%p3977_p13), %s4468_s7, 256, %s574_s23, [#allocation9], %s3789_s28, %s3789_s28, %s3790_s27  }
  0x78   : > { %s3618_s4 = scalar_lea.vmem %s601_s19, 256  ;;  %p3626_p10 = scmp.lt.s32.totalorder %s601_s19, %s601_s19 }
  0x79   : > { %p3619_p2 = scmp.ne.s32.totalorder %s601_s19, %s3618_s4  ;;  %p3627_p11 = scmp.lt.s32.totalorder %s3618_s4, %s3618_s4 }
  0x7b   : > { %p3621_p4 = pnand %p3619_p2, %p3983_p0  ;;  %p3628_p3 = por %p3627_p11, %p3626_p10 }
  0x7d   : > { %p3622_p8 = pneg %p3621_p4 }
  0x7f   : > { %p3629_p5 = pnand %p3628_p3, %p3622_p8 }
  0x81   : > { %3632 = shalt.err (!%p3629_p5)
}
  0x82   : > { %3268 = dma.hbm_to_vmem [thread:$0]  (!%p3977_p13), %s4471_s10, 256, %s601_s19, [#allocation12], %s3789_s28, %s3789_s28, %s3790_s27  }
  0x83   : > { %s3797_s23 = smov [#allocation16]   ;;  %s3798_s20 = smov [#allocation17]  }
  0x84   : > { %s629_s1 = sshll.u32 %s3797_s23, 4  ;;  %s649_s25 = sshll.u32 %s3798_s20, 4  ;;  %s630_s1 = int_to_ptr.vmem [resolvable:$true] %s629_s1  ;;  %s650_s25 = int_to_ptr.vmem [resolvable:$true] %s649_s25 }
  0x85   : > { %s3644_s22 = scalar_lea.vmem %s630_s1, 256  ;;  %p3652_p12 = scmp.lt.s32.totalorder %s630_s1, %s630_s1 }
  0x86   : > { %p3645_p6 = scmp.ne.s32.totalorder %s630_s1, %s3644_s22  ;;  %p3653_p1 = scmp.lt.s32.totalorder %s3644_s22, %s3644_s22 }
  0x88   : > { %p3647_p7 = pnand %p3645_p6, %p3983_p0  ;;  %p3654_p2 = por %p3653_p1, %p3652_p12 }
  0x8a   : > { %p3648_p9 = pneg %p3647_p7 }
  0x8c   : > { %p3655_p4 = pnand %p3654_p2, %p3648_p9 }
  0x8e   : > { %3658 = shalt.err (!%p3655_p4)
}
  0x8f   : > { %3274 = dma.hbm_to_vmem [thread:$0]  (!%p3977_p13), %s4474_s13, 256, %s630_s1, [#allocation15], %s3789_s28, %s3789_s28, %s3790_s27  }
  0x90   : > { %s3670_s26 = scalar_lea.vmem %s650_s25, 16  ;;  %s3677_s3 = scalar_lea.vmem %s650_s25, 32 }
  0x91   : > { %p3671_p8 = scmp.ne.s32.totalorder %s650_s25, %s3670_s26  ;;  %p3678_p3 = scmp.lt.s32.totalorder %s650_s25, %s650_s25 }
  0x92   : > { %p3679_p5 = scmp.lt.s32.totalorder %s3677_s3, %s3670_s26 }
  0x93   : > { %p3673_p10 = pnand %p3671_p8, %p3983_p0 }
  0x94   : > { %p3680_p6 = por %p3679_p5, %p3678_p3 }
  0x95   : > { %p3674_p11 = pneg %p3673_p10 }
  0x97   : > { %p3681_p7 = pnand %p3680_p6, %p3674_p11 }
  0x99   : > { %3684 = shalt.err (!%p3681_p7)
}
  0x9a   : > { %3277 = dma.hbm_to_vmem [thread:$0]  (!%p3977_p13), %s4477_s16, 16, %s650_s25, [#allocation18]  }
  0x9b   : > { %p4520_p9 = scmp.ne.s32.totalorder %s4514_s29, 0 }
  0x9c   : > { %p4521_p12 = scmp.ne.s32.totalorder (!%p4520_p9), %s4515_s0, 0 }
  0x9d   : > { %692 = sbr.rel (%p4520_p9) target bundleno = 6868 (0x1ad4), region = 96 }
  0xa2   : > { %3736 = dma.done.wait (%p4521_p12), [#allocation3], 128  }
  0xa3   : > { %3738 = vsyncadd (%p4521_p12), [#allocation3], 4294967168 }
  0xa4   : > { %3740 = dma.done.wait (%p4521_p12), [#allocation6], 384  }
  0xa5   : > { %3742 = vsyncadd (%p4521_p12), [#allocation6], 4294966912 }
  0xa6   : > { %3744 = dma.done.wait (%p4521_p12), [#allocation9], 512  }
  0xa7   : > { %3746 = vsyncadd (%p4521_p12), [#allocation9], 4294966784 }
  0xa8   : > { %3748 = dma.done.wait (%p4521_p12), [#allocation12], 320  }
  0xa9   : > { %3750 = vsyncadd (%p4521_p12), [#allocation12], 4294966976 }
  0xaa   : > { %3752 = dma.done.wait (%p4521_p12), [#allocation15], 512  }
  0xab   : > { %3754 = vsyncadd (%p4521_p12), [#allocation15], 4294966784 }
  0xac   : > { %3756 = dma.done.wait (%p4521_p12), [#allocation18], 16  }
  0xad   : > { %3758 = vsyncadd (%p4521_p12), [#allocation18], 4294967280  ;;  %p794_p13 = scmp.lt.s32.totalorder %s3777_s21, 1  ;;  %v3799_v0 = vmov 0.0   ;;  %vm3800_vm0 = vmmov 0   ;;  %v3373_v1 = vld [vmem:[#allocation8 + $0x8] sm:$0xff]  }
  0xae   : > { %3017 = vmatprep.subr.bf16.mxu1 %v3799_v0  ;;  %3009 = vmatprep.subr.bf16.mxu0 %v3799_v0  ;;  %v3374_v2 = vld [vmem:[#allocation7 + $0x8] sm:$0xff]   ;;  %s4522_s2 = sld [smem:[#allocation36_spill]]  ;;  %v3375_v3 = vld [vmem:[#allocation8] sm:$0xff]   ;;  %v3376_v4 = vld [vmem:[#allocation7] sm:$0xff]   ;;  %vm837_vm1 = vcmask 261120   ;;  %vm970_vm2 = vcmask 64512  }
  0xaf   : > { %3021 = vmatprep.mubr.msk.bf16.mxu1 %vm3800_vm0, %v3799_v0  ;;  %s795_s24 = scalar_select %p794_p13, %s3777_s21, 1  ;;  %3013 = vmatprep.mubr.msk.bf16.mxu0 %vm3800_vm0, %v3799_v0  ;;  %v2884_v9 = vld [vmem:[#allocation11 + $0x1] ss:$0 sm:$0xff]  ;;  %v2877_v14 = vld [vmem:[#allocation11] ss:$0 sm:$0xff]  ;;  %vm1037_vm3 = vcmask 1043456  }
  0xb0   : > { %s4523_s22 = sld [smem:[#allocation35_spill]]  ;;  %3018 = vmatpush3.bf16.msra.mxu1 %v3373_v1  ;;  %3010 = vmatpush3.bf16.msra.mxu0 %v3374_v2  ;;  %v4144_v25 = vld [vmem:[#allocation2] sm:$0xff]  ;;  %s3801_s4 = smov 32   ;;  %v957_v50 = vld [vmem:[#allocation10] sm:$0xf]  ;;  %vm2565_vm4 = vcmask 523264  }
  0xb1   : > { %s4109_s27 = sshll.u32 %s795_s24, 3  ;;  %3019 = vmatprep.subr.bf16.mxu1 %v3799_v0  ;;  %3011 = vmatprep.subr.bf16.mxu0 %v3799_v0  ;;  %v2885_v32 = vld [vmem:[#allocation11 + $0x2] ss:$0 sm:$0xff]  ;;  %s3802_s26 = smov 96   ;;  %v1086_v51 = vsel %vm1037_vm3, %v957_v50, 0 }
  0xb2   : > { %s3803_s3 = smov 120   ;;  %s3804_s23 = smov 88  }
  0xb3   : > { %s3805_s20 = smov 112   ;;  %s4496_s24 = smov 104  }
  0xb4   : > { %s804_s28 = scalar_lea.vmem %s4522_s2, %s4109_s27  ;;  %3020 = vmatpush3.bf16.msra.mxu1 %v3375_v3  ;;  %3012 = vmatpush3.bf16.msra.mxu0 %v3376_v4  ;;  %s3807_s0 = smov 80  }
  0xb5   : > { %v811_v5 = vld [vmem:[%s804_s28] sm:$0xff]  ;;  %3031 = vmatprep.subr.bf16.mxu1 %v3799_v0  ;;  %3025 = vmatprep.subr.bf16.mxu0 %v3799_v0  ;;  %s4495_s29 = smov 72   ;;  %s4524_s1 = sld [smem:[#allocation37_spill]] }
  0xb6   : > { %s800_s19 = scalar_lea.vmem %s4523_s22, %s4109_s27  ;;  %v881_v7 = vpack.c.bf16 %v811_v5, %v811_v5  ;;  %s3809_s28 = smov [#allocation19]  }
  0xb7   : > { %v4121_v6 = vld [vmem:[%s800_s19] sm:$0xff] }
  0xb8   : > { %v815_v8 = vpack.c.bf16 %v4121_v6, %v4121_v6  ;;  %3022 = vmatmul.mubr.msk.bf16.vlgmr.msra.gmra.mxu1 %vm837_vm1, %v881_v7 }
  0xb9   : > { %3033 = vmatprep.mubr.msk.bf16.mxu1 %vm3800_vm0, %v3799_v0 }
  0xba   : > { %3014 = vmatmul.mubr.msk.bf16.vlgmr.msra.gmra.mxu0 %vm837_vm1, %v815_v8 }
  0xbb   : > { %3027 = vmatprep.mubr.msk.bf16.mxu0 %vm3800_vm0, %v3799_v0  ;;  %s808_s25 = scalar_lea.vmem %s4524_s1, %s4109_s27  ;;  %s3689_s1 = sshll.u32 %s3809_s28, 4  ;;  %s3690_s1 = int_to_ptr.vmem [resolvable:$false] %s3689_s1 }
 0x178   : > { %v935_v10 = vpop.f32.mrf.mxu1 }
 0x179   : > { %v946_v11 = vadd.f32 %v2884_v9, %v935_v10 }
 0x17a   : > { %v875_v12 = vpop.f32.mrf.mxu0  ;;  %v3023_v13 = vpop.f32.mrf.mxu1 }
 0x17b   : > { %v4133_v15 = vpack.c.bf16 %v946_v11, %v946_v11  ;;  %v876_v18 = vadd.f32 %v2877_v14, %v875_v12 }
 0x17c   : > { %v3015_v16 = vpop.f32.mrf.mxu0  ;;  %v938_v17 = vpop.f32.mrf.mxu1 }
 0x17d   : > { %v975_v19 = vsel %vm970_vm2, %v4133_v15, 0  ;;  %v4138_v23 = vpack.c.bf16 %v876_v18, %v876_v18 }
 0x17e   : > { %v878_v20 = vpop.f32.mrf.mxu0  ;;  %v3024_v21 = vpop.f32.mrf.mxu1  ;;  %3026 = vmatpush3.bf16.xpose.msra.mxu0 %v975_v19 }
 0x17f   : > { %3037 = vmatprep.subr.bf16.mxu0 %v3799_v0  ;;  %v958_v21 = vld [vmem:[#allocation10 + $0x4] sm:$0xf] }
 0x180   : > { %v3016_v22 = vpop.f32.mrf.mxu0 }
 0x181   : > { %v1248_v22 = vsel %vm1037_vm3, %v958_v21, 0 }
 0x185   : > { %3028 = vmatmul.mubr.msk.bf16.vlgmr.msra.gmra.mxu0 %vm970_vm2, %v4138_v23 }
 0x186   : > { %3039 = vmatprep.mubr.msk.bf16.mxu0 %vm3800_vm0, %v3799_v0  ;;  %3038 = vmatpush3.bf16.msra.mxu0 %v1086_v51 }
 0x187   : > { %3049 = vmatprep.subr.bf16.mxu0 %v3799_v0 }
 0x245   : > { %v1011_v24 = vpop.f32.mrf.mxu0 }
 0x246   : > { %v1017_v26 = vmul.f32 0.35355338, %v1011_v24 }
 0x247   : > { %v3029_v27 = vpop.f32.mrf.mxu0 }
 0x248   : > { %v1018_v28 = vadd.f32 %v1017_v26, %v4144_v25 }
 0x249   : > { %v1014_v29 = vpop.f32.mrf.mxu0 }
 0x24a   : > { %v1019_v30 = vsel %vm970_vm2, %v1018_v28, -inf }
 0x24b   : > { %1020 = vmax.xlane.f32.xlu0 %v1019_v30  ;;  %v3030_v31 = vpop.f32.mrf.mxu0 }
 0x261   : > { %953 = vrot.lane.b32.xlu0 %v2885_v32, %s3801_s4 }
 0x2d4   : > { %v1021_v33 = vpop.xlane.xlu0 %1020 }
 0x2d5   : > { %v1022_v37 = vsub.f32 %v1018_v28, %v1021_v33 }
 0x2d7   : > { %v1023_v38 = vmul.f32 1.442695, %v1022_v37 }
 0x2d8   : > { %v954_v34 = vpop.permute.xlu0 %953 }
 0x2d9   : > { %v956_v35 = vadd.f32 %v954_v34, %v935_v10  ;;  %3387 = vpow2.f32 %v1023_v38 }
 0x2db   : > { %v4149_v36 = vpack.c.bf16 %v956_v35, %v956_v35 }
 0x2dd   : > { %1032 = vrot.lane.b32.xlu1 %v4149_v36, %s3802_s26 }
 0x2e6   : > { %v3388_v39 = vpop.eup %3387 }
 0x2e7   : > { %v1025_v40 = vsel %vm970_vm2, %v3388_v39, 0.0 }
 0x301   : > { %1026 = vadd.xlane.f32.xlu1 %v1025_v40 }
 0x312   : > { %1133 = vrot.lane.b32.xlu1 %v4133_v15, %s3803_s3 }
 0x316   : > { %1130 = vrot.lane.b32.xlu1 %v4138_v23, %s3803_s3 }
 0x34f   : > { %v1033_v41 = vpop.permute.xlu1 %1032 }
 0x350   : > { %v1039_v42 = vsel %vm1037_vm3, %v1033_v41, 0 }
 0x351   : > { %3032 = vmatpush3.bf16.msra.mxu1 %v1039_v42 }
 0x352   : > { %3043 = vmatprep.subr.bf16.mxu1 %v3799_v0 }
 0x38a   : > { %v1027_v43 = vpop.xlane.xlu1 %1026 }
 0x38b   : > { %3389 = vrcp.f32 %v1027_v43  ;;  %v2886_v43 = vld [vmem:[#allocation11 + $0x3] ss:$0 sm:$0xff] }
 0x38e   : > { %v1134_v46 = vpop.permute.xlu1 %1133 }
 0x38f   : > { %v1139_v48 = vsel %vm970_vm2, %v1134_v46, 0 }
 0x392   : > { %v1131_v49 = vpop.permute.xlu1 %1130 }
 0x398   : > { %v3390_v44 = vpop.eup %3389 }
 0x399   : > { %v1029_v45 = vmul.f32 %v3390_v44, %v3388_v39 }
 0x39b   : > { %v1030_v47 = vpack.c.bf16 %v1029_v45, %v1029_v45 }
 0x39d   : > { %3034 = vmatmul.mubr.msk.bf16.vlgmr.msra.gmra.mxu1 %vm970_vm2, %v1030_v47 }
 0x39e   : > { %3044 = vmatpush3.bf16.xpose.msra.mxu1 %v1139_v48  ;;  %3045 = vmatprep.mubr.msk.bf16.mxu1 %vm3800_vm0, %v3799_v0 }
 0x39f   : > { %3055 = vmatprep.subr.bf16.mxu1 %v3799_v0 }
 0x3a5   : > { %3046 = vmatmul.mubr.msk.bf16.vlgmr.msra.gmra.mxu1 %vm970_vm2, %v1131_v49 }
 0x3a6   : > { %3057 = vmatprep.mubr.msk.bf16.mxu1 %vm3800_vm0, %v3799_v0  ;;  %3056 = vmatpush3.bf16.msra.mxu1 %v1248_v22 }
 0x3a7   : > { %3067 = vmatprep.subr.bf16.mxu1 %v3799_v0 }
 0x45d   : > { %v1075_v52 = vpop.f32.mrf.mxu1 }
 0x45e   : > { %v1081_v53 = vpack.c.bf16 %v1075_v52, %v1075_v52 }
 0x45f   : > { %v3035_v54 = vpop.f32.mrf.mxu1 }
 0x460   : > { %3040 = vmatmul.mubr.msk.bf16.vlgmr.msra.gmra.mxu0 %vm970_vm2, %v1081_v53 }
 0x461   : > { %v1078_v55 = vpop.f32.mrf.mxu1  ;;  %3051 = vmatprep.mubr.msk.bf16.mxu0 %vm3800_vm0, %v3799_v0 }
 0x463   : > { %v3036_v56 = vpop.f32.mrf.mxu1 }
 0x465   : > { %v1175_v57 = vpop.f32.mrf.mxu1 }
 0x466   : > { %v1181_v58 = vmul.f32 0.35355338, %v1175_v57  ;;  %v959_v57 = vld [vmem:[#allocation10 + $0x8] sm:$0xf] }
 0x467   : > { %v3047_v59 = vpop.f32.mrf.mxu1 }
 0x468   : > { %v1182_v60 = vadd.f32 %v1181_v58, %v4144_v25  ;;  %v1408_v58 = vsel %vm1037_vm3, %v959_v57, 0 }
 0x469   : > { %v1178_v61 = vpop.f32.mrf.mxu1 }
 0x46a   : > { %v1183_v62 = vsel %vm970_vm2, %v1182_v60, -inf }
 0x46b   : > { %1184 = vmax.xlane.f32.xlu0 %v1183_v62  ;;  %v3048_v63 = vpop.f32.mrf.mxu1 }
 0x481   : > { %1195 = vrot.lane.b32.xlu0 %v4149_v36, %s3804_s23 }
 0x485   : > { %1291 = vrot.lane.b32.xlu0 %v4138_v23, %s3805_s20 }
 0x4f4   : > { %v1185_v1 = vpop.xlane.xlu0 %1184 }
 0x4f5   : > { %v1186_v2 = vsub.f32 %v1182_v60, %v1185_v1 }
 0x4f7   : > { %v1187_v3 = vmul.f32 1.442695, %v1186_v2 }
 0x4f8   : > { %v1196_v4 = vpop.permute.xlu0 %1195 }
 0x4f9   : > { %3391 = vpow2.f32 %v1187_v3  ;;  %v1201_v5 = vsel %vm1037_vm3, %v1196_v4, 0 }
 0x4fa   : > { %3050 = vmatpush3.bf16.msra.mxu0 %v1201_v5 }
 0x4fb   : > { %3061 = vmatprep.subr.bf16.mxu0 %v3799_v0 }
 0x4fc   : > { %v1292_v20 = vpop.permute.xlu0 %1291 }
 0x506   : > { %v3392_v7 = vpop.eup %3391 }
 0x507   : > { %v1189_v8 = vsel %vm970_vm2, %v3392_v7, 0.0 }
 0x508   : > { %1190 = vadd.xlane.f32.xlu1 %v1189_v8 }
 0x519   : > { %1293 = vrot.lane.b32.xlu1 %v4133_v15, %s3805_s20 }
 0x520   : > { %v1122_v9 = vpop.f32.mrf.mxu0 }
 0x521   : > { %v1128_v44 = vadd.f32 %v2886_v43, %v1122_v9 }
 0x522   : > { %v3041_v10 = vpop.f32.mrf.mxu0 }
 0x524   : > { %v1125_v11 = vpop.f32.mrf.mxu0 }
 0x526   : > { %v3042_v12 = vpop.f32.mrf.mxu0 }
 0x591   : > { %v1191_v13 = vpop.xlane.xlu1 %1190 }
 0x592   : > { %3393 = vrcp.f32 %v1191_v13 }
 0x595   : > { %v1294_v17 = vpop.permute.xlu1 %1293 }
 0x596   : > { %v1299_v19 = vsel %vm970_vm2, %v1294_v17, 0 }
 0x59f   : > { %v3394_v14 = vpop.eup %3393 }
 0x5a0   : > { %v1193_v16 = vmul.f32 %v3394_v14, %v3392_v7 }
 0x5a2   : > { %v1194_v18 = vpack.c.bf16 %v1193_v16, %v1193_v16 }
 0x5a4   : > { %3052 = vmatmul.mubr.msk.bf16.vlgmr.msra.gmra.mxu0 %vm970_vm2, %v1194_v18 }
 0x5a5   : > { %3062 = vmatpush3.bf16.xpose.msra.mxu0 %v1299_v19  ;;  %3063 = vmatprep.mubr.msk.bf16.mxu0 %vm3800_vm0, %v3799_v0 }
 0x5a6   : > { %3073 = vmatprep.subr.bf16.mxu0 %v3799_v0 }
 0x5ac   : > { %3064 = vmatmul.mubr.msk.bf16.vlgmr.msra.gmra.mxu0 %vm970_vm2, %v1292_v20  ;;  %v960_v20 = vld [vmem:[#allocation10 + $0xc] sm:$0xf] }
 0x5ad   : > { %3075 = vmatprep.mubr.msk.bf16.mxu0 %vm3800_vm0, %v3799_v0  ;;  %3074 = vmatpush3.bf16.msra.mxu0 %v1408_v58 }
 0x5ae   : > { %3085 = vmatprep.subr.bf16.mxu0 %v3799_v0 }
 0x664   : > { %v1237_v24 = vpop.f32.mrf.mxu0 }
 0x665   : > { %v1243_v26 = vpack.c.bf16 %v1237_v24, %v1237_v24 }
 0x666   : > { %v3053_v27 = vpop.f32.mrf.mxu0 }
 0x667   : > { %3058 = vmatmul.mubr.msk.bf16.vlgmr.msra.gmra.mxu1 %vm970_vm2, %v1243_v26 }
 0x668   : > { %v1240_v28 = vpop.f32.mrf.mxu0  ;;  %3069 = vmatprep.mubr.msk.bf16.mxu1 %vm3800_vm0, %v3799_v0 }
 0x66a   : > { %v3054_v29 = vpop.f32.mrf.mxu0 }
 0x66c   : > { %v1335_v30 = vpop.f32.mrf.mxu0 }
 0x66d   : > { %v1341_v31 = vmul.f32 0.35355338, %v1335_v30 }
 0x66e   : > { %v3065_v32 = vpop.f32.mrf.mxu0 }
 0x66f   : > { %v1342_v33 = vadd.f32 %v1341_v31, %v4144_v25 }
 0x670   : > { %v1338_v34 = vpop.f32.mrf.mxu0 }
 0x671   : > { %v1343_v35 = vsel %vm970_vm2, %v1342_v33, -inf }
 0x672   : > { %1344 = vmax.xlane.f32.xlu1 %v1343_v35  ;;  %v3066_v37 = vpop.f32.mrf.mxu0 }
 0x683   : > { %1453 = vrot.lane.b32.xlu1 %v4133_v15, %s4496_s24 }
 0x687   : > { %1451 = vrot.lane.b32.xlu1 %v4138_v23, %s4496_s24 }
 0x6fb   : > { %v1345_v38 = vpop.xlane.xlu1 %1344 }
 0x6fc   : > { %v1346_v39 = vsub.f32 %v1342_v33, %v1345_v38 }
 0x6fe   : > { %v1347_v40 = vmul.f32 1.442695, %v1346_v39 }
 0x6ff   : > { %v1454_v53 = vpop.permute.xlu1 %1453 }
 0x700   : > { %3395 = vpow2.f32 %v1347_v40  ;;  %v1459_v55 = vsel %vm970_vm2, %v1454_v53, 0  ;;  %v2899_v53 = vld [vmem:[%s4478_s17] ss:$0 sm:$0xff] }
 0x703   : > { %v1452_v56 = vpop.permute.xlu1 %1451 }
 0x70d   : > { %v3396_v41 = vpop.eup %3395 }
 0x70e   : > { %v1349_v42 = vsel %vm970_vm2, %v3396_v41, 0.0 }
 0x70f   : > { %1350 = vadd.xlane.f32.xlu0 %v1349_v42 }
 0x725   : > { %1355 = vrot.lane.b32.xlu0 %v4149_v36, %s3807_s0 }
 0x727   : > { %v1284_v45 = vpop.f32.mrf.mxu1 }
 0x728   : > { %v1290_v46 = vadd.f32 %v1284_v45, %v1128_v44 }
 0x729   : > { %v3059_v15 = vpop.f32.mrf.mxu1 }
 0x72a   : > { %v3378_v15 = vld [vmem:[#allocation13] sm:$0xff]  }
 0x72b   : > { %v1287_v47 = vpop.f32.mrf.mxu1 }
 0x72d   : > { %v3060_v48 = vpop.f32.mrf.mxu1 }
 0x72e   : > { %v3379_v48 = vld [vmem:[%s4470_s9 + $0x8] sm:$0xff]  }
 0x798   : > { %v1351_v23 = vpop.xlane.xlu0 %1350 }
 0x799   : > { %3397 = vrcp.f32 %v1351_v23  ;;  %v3380_v23 = vld [vmem:[%s4470_s9] sm:$0xff]  }
 0x79c   : > { %v1356_v49 = vpop.permute.xlu0 %1355 }
 0x79d   : > { %v1361_v50 = vsel %vm1037_vm3, %v1356_v49, 0 }
 0x79e   : > { %3068 = vmatpush3.bf16.msra.mxu1 %v1361_v50 }
 0x79f   : > { %3079 = vmatprep.subr.bf16.mxu1 %v3799_v0 }
 0x7a6   : > { %v3398_v51 = vpop.eup %3397 }
 0x7a7   : > { %v1353_v52 = vmul.f32 %v3398_v51, %v3396_v41 }
 0x7a9   : > { %v1354_v54 = vpack.c.bf16 %v1353_v52, %v1353_v52 }
 0x7ab   : > { %3070 = vmatmul.mubr.msk.bf16.vlgmr.msra.gmra.mxu1 %vm970_vm2, %v1354_v54 }
 0x7ac   : > { %3080 = vmatpush3.bf16.xpose.msra.mxu1 %v1459_v55  ;;  %3081 = vmatprep.mubr.msk.bf16.mxu1 %vm3800_vm0, %v3799_v0  ;;  %v2900_v55 = vld [vmem:[%s4479_s18] ss:$0 sm:$0xff] }
 0x7ad   : > { %3091 = vmatprep.subr.bf16.mxu1 %v3799_v0 }
 0x7b3   : > { %3082 = vmatmul.mubr.msk.bf16.vlgmr.msra.gmra.mxu1 %vm970_vm2, %v1452_v56 }
 0x7b4   : > { %3093 = vmatprep.mubr.msk.bf16.mxu1 %vm3800_vm0, %v3799_v0 }
 0x86b   : > { %v1397_v59 = vpop.f32.mrf.mxu1 }
 0x86c   : > { %v1403_v60 = vpack.c.bf16 %v1397_v59, %v1397_v59  ;;  %v2908_v59 = vld [vmem:[%s4473_s12 + $0x1] ss:$0 sm:$0xff] }
 0x86d   : > { %v3071_v61 = vpop.f32.mrf.mxu1 }
 0x86e   : > { %3076 = vmatmul.mubr.msk.bf16.vlgmr.msra.gmra.mxu0 %vm970_vm2, %v1403_v60 }
 0x86f   : > { %v1400_v62 = vpop.f32.mrf.mxu1  ;;  %3087 = vmatprep.mubr.msk.bf16.mxu0 %vm3800_vm0, %v3799_v0 }
 0x871   : > { %v3072_v63 = vpop.f32.mrf.mxu1 }
 0x873   : > { %v1495_v1 = vpop.f32.mrf.mxu1 }
 0x874   : > { %v1501_v2 = vmul.f32 0.35355338, %v1495_v1 }
 0x875   : > { %v3083_v3 = vpop.f32.mrf.mxu1 }
 0x876   : > { %v1502_v4 = vadd.f32 %v1501_v2, %v4144_v25 }
 0x877   : > { %v1498_v5 = vpop.f32.mrf.mxu1 }
 0x878   : > { %v1503_v7 = vsel %vm970_vm2, %v1502_v4, -inf }
 0x879   : > { %1504 = vmax.xlane.f32.xlu0 %v1503_v7  ;;  %v3084_v8 = vpop.f32.mrf.mxu1 }
 0x88f   : > { %1515 = vrot.lane.b32.xlu0 %v4149_v36, %s4495_s29  ;;  %v1568_v36 = vsel %vm1037_vm3, %v960_v20, 0  ;;  %v2909_v20 = vld [vmem:[%s4473_s12 + $0x2] ss:$0 sm:$0xff]  ;;  %s2938_s29 = sshll.u32 %s3777_s21, 7  ;;  %s3691_s21 = scalar_lea.vmem %s3690_s1, 256 }
 0x890   : > { %3092 = vmatpush3.bf16.msra.mxu1 %v1568_v36 }
 0x891   : > { %3105 = vmatprep.subr.bf16.mxu1 %v3799_v0 }
 0x902   : > { %v1505_v9 = vpop.xlane.xlu0 %1504 }
 0x903   : > { %v1506_v10 = vsub.f32 %v1502_v4, %v1505_v9  ;;  %v2901_v4 = vld [vmem:[%s4473_s12] ss:$0 sm:$0xff] }
 0x905   : > { %v1507_v11 = vmul.f32 1.442695, %v1506_v10 }
 0x906   : > { %v1516_v12 = vpop.permute.xlu0 %1515 }
 0x907   : > { %3399 = vpow2.f32 %v1507_v11  ;;  %v1521_v13 = vsel %vm1037_vm3, %v1516_v12, 0 }
 0x908   : > { %3086 = vmatpush3.bf16.msra.mxu0 %v1521_v13  ;;  %v4286_v13 = vld [vmem:[#allocation5] sm:$0xff] }
 0x909   : > { %3097 = vmatprep.subr.bf16.mxu0 %v3799_v0 }
 0x914   : > { %v3400_v25 = vpop.eup %3399 }
 0x915   : > { %v1509_v14 = vsel %vm970_vm2, %v3400_v25, 0.0 }
 0x916   : > { %1510 = vadd.xlane.f32.xlu1 %v1509_v14 }
 0x92e   : > { %v1444_v16 = vpop.f32.mrf.mxu0 }
 0x92f   : > { %v1450_v17 = vadd.f32 %v1444_v16, %v1290_v46  ;;  %v3377_v46 = vld [vmem:[#allocation13 + $0x8] sm:$0xff]  }
 0x930   : > { %v3077_v18 = vpop.f32.mrf.mxu0 }
 0x932   : > { %v1447_v19 = vpop.f32.mrf.mxu0 }
 0x934   : > { %v3078_v21 = vpop.f32.mrf.mxu0 }
 0x99f   : > { %v1511_v22 = vpop.xlane.xlu1 %1510 }
 0x9a0   : > { %3401 = vrcp.f32 %v1511_v22 }
 0x9ad   : > { %v3402_v24 = vpop.eup %3401 }
 0x9ae   : > { %v1513_v26 = vmul.f32 %v3402_v24, %v3400_v25 }
 0x9b0   : > { %v1514_v27 = vpack.c.bf16 %v1513_v26, %v1513_v26 }
 0x9b2   : > { %3088 = vmatmul.mubr.msk.bf16.vlgmr.msra.gmra.mxu0 %vm970_vm2, %v1514_v27 }
 0x9b3   : > { %3101 = vmatprep.mubr.msk.bf16.mxu0 %vm3800_vm0, %v3799_v0  ;;  %3098 = vmatpush3.bf16.msra.mxu0 %v3379_v48 }
 0x9b4   : > { %3099 = vmatprep.subr.bf16.mxu0 %v3799_v0 }
 0x9b7   : > { %3100 = vmatpush3.bf16.msra.mxu0 %v3380_v23 }
 0x9b8   : > { %3113 = vmatprep.subr.bf16.mxu0 %v3799_v0 }
 0xa72   : > { %v1557_v28 = vpop.f32.mrf.mxu0 }
 0xa73   : > { %v1563_v29 = vpack.c.bf16 %v1557_v28, %v1557_v28 }
 0xa74   : > { %v3089_v30 = vpop.f32.mrf.mxu0 }
 0xa75   : > { %3094 = vmatmul.mubr.msk.bf16.vlgmr.msra.gmra.mxu1 %vm970_vm2, %v1563_v29  ;;  %v1779_v30 = vld [vmem:[#allocation14] sm:$0xf] }
 0xa76   : > { %v1560_v31 = vpop.f32.mrf.mxu0  ;;  %3109 = vmatprep.mubr.msk.bf16.mxu1 %vm3800_vm0, %v3799_v0  ;;  %3106 = vmatpush3.bf16.msra.mxu1 %v3377_v46 }
 0xa77   : > { %3107 = vmatprep.subr.bf16.mxu1 %v3799_v0  ;;  %v1906_v31 = vsel %vm1037_vm3, %v1779_v30, 0 }
 0xa78   : > { %v3090_v32 = vpop.f32.mrf.mxu0 }
 0xa7a   : > { %3108 = vmatpush3.bf16.msra.mxu1 %v3378_v15 }
 0xa7b   : > { %3119 = vmatprep.subr.bf16.mxu1 %v3799_v0 }
 0xb35   : > { %v1604_v33 = vpop.f32.mrf.mxu1 }
 0xb36   : > { %v1610_v34 = vadd.f32 %v1604_v33, %v1450_v17 }
 0xb37   : > { %v3095_v35 = vpop.f32.mrf.mxu1 }
 0xb38   : > { %v1611_v37 = vadd.f32 %v1610_v34, %v4121_v6  ;;  %v812_v6 = vld [vmem:[%s808_s25] sm:$0xff] }
 0xb39   : > { %v1607_v38 = vpop.f32.mrf.mxu1  ;;  %v1703_v47 = vpack.c.bf16 %v812_v6, %v812_v6 }
 0xb3a   : > { %v1614_v39 = vsel %vm837_vm1, %v1611_v37, 0.0 }
 0xb3b   : > { %1615 = vadd.xlane.f32.xlu1 %v1614_v39  ;;  %v3096_v40 = vpop.f32.mrf.mxu1  ;;  %3110 = vmatmul.mubr.msk.bf16.vlgmr.msra.gmra.mxu1 %vm837_vm1, %v1703_v47 }
 0xb3c   : > { %3121 = vmatprep.mubr.msk.bf16.mxu1 %vm3800_vm0, %v3799_v0 }
 0xbc4   : > { %v1616_v41 = vpop.xlane.xlu1 %1615 }
 0xbc5   : > { %v1618_v42 = vmul.f32 0.03125, %v1616_v41 }
 0xbc7   : > { %v1619_v43 = vsub.f32 %v1611_v37, %v1618_v42 }
 0xbc9   : > { %v1620_v44 = vmul.f32 %v1619_v43, %v1619_v43 }
 0xbcb   : > { %v1621_v45 = vsel %vm837_vm1, %v1620_v44, 0.0 }
 0xbcc   : > { %1622 = vadd.xlane.f32.xlu1 %v1621_v45 }
 0xbfb   : > { %v1757_v60 = vpop.f32.mrf.mxu1 }
 0xbfc   : > { %v1768_v61 = vadd.f32 %v2908_v59, %v1757_v60 }
 0xbfd   : > { %v3111_v62 = vpop.f32.mrf.mxu1 }
 0xbfe   : > { %v4272_v63 = vpack.c.bf16 %v1768_v61, %v1768_v61 }
 0xbff   : > { %v1760_v1 = vpop.f32.mrf.mxu1 }
 0xc00   : > { %v1796_v2 = vsel %vm970_vm2, %v4272_v63, 0 }
 0xc01   : > { %v3112_v3 = vpop.f32.mrf.mxu1 }
 0xc55   : > { %v1623_v49 = vpop.xlane.xlu1 %1622 }
 0xc56   : > { %v1624_v50 = vmul.f32 0.03125, %v1623_v49 }
 0xc58   : > { %v1625_v51 = vadd.f32 1e-05, %v1624_v50 }
 0xc5a   : > { %3403 = vrsqrt.f32 %v1625_v51 }
 0xc67   : > { %v3404_v52 = vpop.eup %3403 }
 0xc68   : > { %v1627_v54 = vmul.f32 %v3404_v52, %v1619_v43 }
 0xc6a   : > { %v1632_v56 = vmul.f32 %v2899_v53, %v1627_v54 }
 0xc6c   : > { %v4262_v57 = vadd.f32 %v2900_v55, %v1632_v56 }
 0xc6e   : > { %v1638_v58 = vpack.c.bf16 %v4262_v57, %v4262_v57 }
 0xc70   : > { %3102 = vmatmul.mubr.msk.bf16.vlgmr.msra.gmra.mxu0 %vm837_vm1, %v1638_v58 }
 0xc71   : > { %3115 = vmatprep.mubr.msk.bf16.mxu0 %vm3800_vm0, %v3799_v0  ;;  %3114 = vmatpush3.bf16.xpose.msra.mxu0 %v1796_v2 }
 0xc72   : > { %3125 = vmatprep.subr.bf16.mxu0 %v3799_v0 }
 0xd30   : > { %v1697_v5 = vpop.f32.mrf.mxu0 }
 0xd31   : > { %v1698_v7 = vadd.f32 %v2901_v4, %v1697_v5 }
 0xd32   : > { %v3103_v8 = vpop.f32.mrf.mxu0 }
 0xd33   : > { %v4280_v9 = vpack.c.bf16 %v1698_v7, %v1698_v7 }
 0xd34   : > { %v1700_v10 = vpop.f32.mrf.mxu0 }
 0xd35   : > { %3116 = vmatmul.mubr.msk.bf16.vlgmr.msra.gmra.mxu0 %vm970_vm2, %v4280_v9  ;;  %v1780_v10 = vld [vmem:[#allocation14 + $0x4] sm:$0xf] }
 0xd36   : > { %v3104_v11 = vpop.f32.mrf.mxu0  ;;  %3127 = vmatprep.mubr.msk.bf16.mxu0 %vm3800_vm0, %v3799_v0  ;;  %3126 = vmatpush3.bf16.msra.mxu0 %v1906_v31 }
 0xd37   : > { %3137 = vmatprep.subr.bf16.mxu0 %v3799_v0  ;;  %v2068_v11 = vsel %vm1037_vm3, %v1780_v10, 0 }
 0xdf5   : > { %v1832_v12 = vpop.f32.mrf.mxu0 }
 0xdf6   : > { %v1838_v25 = vmul.f32 0.35355338, %v1832_v12 }
 0xdf7   : > { %v3117_v14 = vpop.f32.mrf.mxu0 }
 0xdf8   : > { %v1839_v16 = vadd.f32 %v1838_v25, %v4286_v13 }
 0xdf9   : > { %v1835_v17 = vpop.f32.mrf.mxu0 }
 0xdfa   : > { %v1840_v18 = vsel %vm970_vm2, %v1839_v16, -inf }
 0xdfb   : > { %1841 = vmax.xlane.f32.xlu1 %v1840_v18  ;;  %v3118_v19 = vpop.f32.mrf.mxu0 }
 0xe0c   : > { %1775 = vrot.lane.b32.xlu1 %v2909_v20, %s3801_s4  ;;  %s4525_s4 = smov 104  }
 0xe84   : > { %v1842_v36 = vpop.xlane.xlu1 %1841 }
 0xe85   : > { %v1843_v21 = vsub.f32 %v1839_v16, %v1842_v36 }
 0xe87   : > { %v1844_v22 = vmul.f32 1.442695, %v1843_v21 }
 0xe88   : > { %v1776_v24 = vpop.permute.xlu1 %1775 }
 0xe89   : > { %3405 = vpow2.f32 %v1844_v22  ;;  %v1778_v26 = vadd.f32 %v1776_v24, %v1757_v60 }
 0xe8b   : > { %v4294_v27 = vpack.c.bf16 %v1778_v26, %v1778_v26 }
 0xe8d   : > { %1853 = vrot.lane.b32.xlu1 %v4294_v27, %s3802_s26 }
 0xe91   : > { %1953 = vrot.lane.b32.xlu1 %v4272_v63, %s3803_s3 }
 0xe95   : > { %1950 = vrot.lane.b32.xlu1 %v4280_v9, %s3803_s3 }
 0xe96   : > { %v3406_v28 = vpop.eup %3405 }
 0xe97   : > { %v1846_v29 = vsel %vm970_vm2, %v3406_v28, 0.0 }
 0xe98   : > { %1847 = vadd.xlane.f32.xlu0 %v1846_v29 }
 0xeae   : > { %2015 = vrot.lane.b32.xlu0 %v4294_v27, %s3804_s23  ;;  %s4526_s23 = smov 72  }
 0xeff   : > { %v1854_v32 = vpop.permute.xlu1 %1853 }
 0xf00   : > { %v1859_v33 = vsel %vm1037_vm3, %v1854_v32, 0 }
 0xf01   : > { %3120 = vmatpush3.bf16.msra.mxu1 %v1859_v33 }
 0xf02   : > { %3131 = vmatprep.subr.bf16.mxu1 %v3799_v0 }
 0xf03   : > { %v1954_v38 = vpop.permute.xlu1 %1953 }
 0xf04   : > { %v1959_v40 = vsel %vm970_vm2, %v1954_v38, 0 }
 0xf07   : > { %v1951_v41 = vpop.permute.xlu1 %1950 }
 0xf21   : > { %v1848_v34 = vpop.xlane.xlu0 %1847 }
 0xf22   : > { %3407 = vrcp.f32 %v1848_v34 }
 0xf25   : > { %v2016_v42 = vpop.permute.xlu0 %2015 }
 0xf26   : > { %v2021_v46 = vsel %vm1037_vm3, %v2016_v42, 0 }
 0xf2f   : > { %v3408_v35 = vpop.eup %3407 }
 0xf30   : > { %v1850_v37 = vmul.f32 %v3408_v35, %v3406_v28 }
 0xf32   : > { %v1851_v39 = vpack.c.bf16 %v1850_v37, %v1850_v37 }
 0xf34   : > { %3122 = vmatmul.mubr.msk.bf16.vlgmr.msra.gmra.mxu1 %vm970_vm2, %v1851_v39 }
 0xf35   : > { %3132 = vmatpush3.bf16.xpose.msra.mxu1 %v1959_v40  ;;  %3133 = vmatprep.mubr.msk.bf16.mxu1 %vm3800_vm0, %v3799_v0 }
 0xf36   : > { %3143 = vmatprep.subr.bf16.mxu1 %v3799_v0 }
 0xf3c   : > { %3134 = vmatmul.mubr.msk.bf16.vlgmr.msra.gmra.mxu1 %vm970_vm2, %v1951_v41 }
 0xf3d   : > { %3145 = vmatprep.mubr.msk.bf16.mxu1 %vm3800_vm0, %v3799_v0  ;;  %3144 = vmatpush3.bf16.msra.mxu1 %v2068_v11 }
 0xf3e   : > { %3155 = vmatprep.subr.bf16.mxu1 %v3799_v0 }
 0xff4   : > { %v1895_v43 = vpop.f32.mrf.mxu1 }
 0xff5   : > { %v1901_v44 = vpack.c.bf16 %v1895_v43, %v1895_v43 }
 0xff6   : > { %v3123_v45 = vpop.f32.mrf.mxu1 }
 0xff7   : > { %3128 = vmatmul.mubr.msk.bf16.vlgmr.msra.gmra.mxu0 %vm970_vm2, %v1901_v44 }
 0xff8   : > { %3138 = vmatpush3.bf16.msra.mxu0 %v2021_v46  ;;  %v1898_v15 = vpop.f32.mrf.mxu1  ;;  %3139 = vmatprep.mubr.msk.bf16.mxu0 %vm3800_vm0, %v3799_v0 }
 0xff9   : > { %3149 = vmatprep.subr.bf16.mxu0 %v3799_v0  ;;  %v1781_v15 = vld [vmem:[#allocation14 + $0x8] sm:$0xf] }
 0xffa   : > { %v3124_v6 = vpop.f32.mrf.mxu1 }
 0xffb   : > { %v2228_v6 = vsel %vm1037_vm3, %v1781_v15, 0  ;;  %v3385_v15 = vld [vmem:[%s4476_s15 + $0x8] sm:$0xff]  }
 0xffc   : > { %v1995_v47 = vpop.f32.mrf.mxu1 }
 0xffd   : > { %v2001_v48 = vmul.f32 0.35355338, %v1995_v47 }
 0xffe   : > { %v3135_v23 = vpop.f32.mrf.mxu1 }
 0xfff   : > { %v2002_v49 = vadd.f32 %v2001_v48, %v4286_v13 }
0x1000   : > { %v1998_v50 = vpop.f32.mrf.mxu1 }
0x1001   : > { %v2003_v51 = vsel %vm970_vm2, %v2002_v49, -inf }
0x1002   : > { %2004 = vmax.xlane.f32.xlu1 %v2003_v51  ;;  %v3136_v52 = vpop.f32.mrf.mxu1 }
0x108b   : > { %v2005_v53 = vpop.xlane.xlu1 %2004 }
0x108c   : > { %v2006_v54 = vsub.f32 %v2002_v49, %v2005_v53 }
0x108e   : > { %v2007_v55 = vmul.f32 1.442695, %v2006_v54 }
0x1090   : > { %3409 = vpow2.f32 %v2007_v55 }
0x109d   : > { %v3410_v56 = vpop.eup %3409 }
0x109e   : > { %v2009_v58 = vsel %vm970_vm2, %v3410_v56, 0.0 }
0x109f   : > { %2010 = vadd.xlane.f32.xlu0 %v2009_v58 }
0x10b5   : > { %2113 = vrot.lane.b32.xlu0 %v4272_v63, %s3805_s20 }
0x10b7   : > { %v1942_v59 = vpop.f32.mrf.mxu0 }
0x10b9   : > { %2111 = vrot.lane.b32.xlu0 %v4280_v9, %s3805_s20  ;;  %v3129_v60 = vpop.f32.mrf.mxu0 }
0x10bb   : > { %v1945_v61 = vpop.f32.mrf.mxu0 }
0x10bd   : > { %v3130_v62 = vpop.f32.mrf.mxu0 }
0x1128   : > { %v2011_v1 = vpop.xlane.xlu0 %2010 }
0x1129   : > { %3411 = vrcp.f32 %v2011_v1 }
0x112c   : > { %v2114_v4 = vpop.permute.xlu0 %2113 }
0x112d   : > { %v2119_v7 = vsel %vm970_vm2, %v2114_v4, 0 }
0x1130   : > { %v2112_v8 = vpop.permute.xlu0 %2111 }
0x1136   : > { %v3412_v2 = vpop.eup %3411 }
0x1137   : > { %v2013_v3 = vmul.f32 %v3412_v2, %v3410_v56 }
0x1139   : > { %v2014_v5 = vpack.c.bf16 %v2013_v3, %v2013_v3 }
0x113b   : > { %3140 = vmatmul.mubr.msk.bf16.vlgmr.msra.gmra.mxu0 %vm970_vm2, %v2014_v5  ;;  %v1782_v5 = vld [vmem:[#allocation14 + $0xc] sm:$0xf] }
0x113c   : > { %3150 = vmatpush3.bf16.xpose.msra.mxu0 %v2119_v7  ;;  %3151 = vmatprep.mubr.msk.bf16.mxu0 %vm3800_vm0, %v3799_v0  ;;  %v2388_v7 = vsel %vm1037_vm3, %v1782_v5, 0 }
0x113d   : > { %3161 = vmatprep.subr.bf16.mxu0 %v3799_v0 }
0x1143   : > { %3152 = vmatmul.mubr.msk.bf16.vlgmr.msra.gmra.mxu0 %vm970_vm2, %v2112_v8 }
0x1144   : > { %3163 = vmatprep.mubr.msk.bf16.mxu0 %vm3800_vm0, %v3799_v0  ;;  %3162 = vmatpush3.bf16.msra.mxu0 %v2228_v6  ;;  %v3386_v6 = vld [vmem:[%s4476_s15] sm:$0xff]  }
0x1145   : > { %3173 = vmatprep.subr.bf16.mxu0 %v3799_v0 }
0x11fb   : > { %v2057_v12 = vpop.f32.mrf.mxu0 }
0x11fc   : > { %v2063_v25 = vpack.c.bf16 %v2057_v12, %v2057_v12 }
0x11fd   : > { %v3141_v14 = vpop.f32.mrf.mxu0 }
0x11fe   : > { %3146 = vmatmul.mubr.msk.bf16.vlgmr.msra.gmra.mxu1 %vm970_vm2, %v2063_v25 }
0x11ff   : > { %v2060_v16 = vpop.f32.mrf.mxu0  ;;  %3157 = vmatprep.mubr.msk.bf16.mxu1 %vm3800_vm0, %v3799_v0 }
0x1201   : > { %v3142_v17 = vpop.f32.mrf.mxu0 }
0x1203   : > { %v2155_v18 = vpop.f32.mrf.mxu0 }
0x1204   : > { %v2161_v19 = vmul.f32 0.35355338, %v2155_v18 }
0x1205   : > { %v3153_v20 = vpop.f32.mrf.mxu0 }
0x1206   : > { %v2162_v36 = vadd.f32 %v2161_v19, %v4286_v13 }
0x1207   : > { %v2158_v21 = vpop.f32.mrf.mxu0 }
0x1208   : > { %v2163_v22 = vsel %vm970_vm2, %v2162_v36, -inf }
0x1209   : > { %2164 = vmax.xlane.f32.xlu1 %v2163_v22  ;;  %v3154_v24 = vpop.f32.mrf.mxu0 }
0x121a   : > { %2175 = vrot.lane.b32.xlu1 %v4294_v27, %s3807_s0  ;;  %s4527_s0 = sld [smem:[#allocation32_spill]] }
0x121e   : > { %2273 = vrot.lane.b32.xlu1 %v4272_v63, %s4525_s4  ;;  %v2910_v63 = vld [vmem:[%s4473_s12 + $0x3] ss:$0 sm:$0xff] }
0x121f   : > { %v1948_v34 = vadd.f32 %v2910_v63, %v1942_v59 }
0x1220   : > { %p4529_p1 = scmp.ne.s32.totalorder %s4527_s0, 0 }
0x1222   : > { %2271 = vrot.lane.b32.xlu1 %v4280_v9, %s4525_s4  ;;  %s4528_s4 = sld [smem:[#allocation40_spill]] }
0x1228   : > { %s2649_s26 = scalar_lea.hbm %s4528_s4, %s2938_s29 }
0x1292   : > { %v2165_v26 = vpop.xlane.xlu1 %2164 }
0x1293   : > { %v2166_v28 = vsub.f32 %v2162_v36, %v2165_v26 }
0x1295   : > { %v2167_v29 = vmul.f32 1.442695, %v2166_v28 }
0x1296   : > { %v2176_v30 = vpop.permute.xlu1 %2175 }
0x1297   : > { %3413 = vpow2.f32 %v2167_v29  ;;  %v2181_v31 = vsel %vm1037_vm3, %v2176_v30, 0 }
0x1298   : > { %3156 = vmatpush3.bf16.msra.mxu1 %v2181_v31 }
0x1299   : > { %3167 = vmatprep.subr.bf16.mxu1 %v3799_v0 }
0x129a   : > { %v2274_v43 = vpop.permute.xlu1 %2273 }
0x129b   : > { %v2279_v45 = vsel %vm970_vm2, %v2274_v43, 0  ;;  %v2924_v43 = vld [vmem:[%s4479_s18 + $0x1] ss:$0 sm:$0xff] }
0x129e   : > { %v2272_v46 = vpop.permute.xlu1 %2271 }
0x12a4   : > { %v3414_v32 = vpop.eup %3413 }
0x12a5   : > { %v2169_v33 = vsel %vm970_vm2, %v3414_v32, 0.0 }
0x12a6   : > { %2170 = vadd.xlane.f32.xlu0 %v2169_v33 }
0x12be   : > { %v2104_v9 = vpop.f32.mrf.mxu1 }
0x12bf   : > { %v2110_v35 = vadd.f32 %v2104_v9, %v1948_v34  ;;  %v3381_v34 = vld [vmem:[#allocation16 + $0x8] sm:$0xff]   ;;  %v3382_v9 = vld [vmem:[#allocation16] sm:$0xff]  }
0x12c0   : > { %v3147_v37 = vpop.f32.mrf.mxu1 }
0x12c2   : > { %v2107_v38 = vpop.f32.mrf.mxu1 }
0x12c4   : > { %v3148_v39 = vpop.f32.mrf.mxu1 }
0x132f   : > { %v2171_v40 = vpop.xlane.xlu0 %2170 }
0x1330   : > { %3415 = vrcp.f32 %v2171_v40 }
0x133d   : > { %v3416_v41 = vpop.eup %3415 }
0x133e   : > { %v2173_v42 = vmul.f32 %v3416_v41, %v3414_v32  ;;  %v2923_v41 = vld [vmem:[%s4478_s17 + $0x1] ss:$0 sm:$0xff] }
0x1340   : > { %v2174_v44 = vpack.c.bf16 %v2173_v42, %v2173_v42 }
0x1342   : > { %3158 = vmatmul.mubr.msk.bf16.vlgmr.msra.gmra.mxu1 %vm970_vm2, %v2174_v44 }
0x1343   : > { %3168 = vmatpush3.bf16.xpose.msra.mxu1 %v2279_v45  ;;  %3169 = vmatprep.mubr.msk.bf16.mxu1 %vm3800_vm0, %v3799_v0 }
0x1344   : > { %3179 = vmatprep.subr.bf16.mxu1 %v3799_v0 }
0x134a   : > { %3170 = vmatmul.mubr.msk.bf16.vlgmr.msra.gmra.mxu1 %vm970_vm2, %v2272_v46 }
0x134b   : > { %3181 = vmatprep.mubr.msk.bf16.mxu1 %vm3800_vm0, %v3799_v0  ;;  %3180 = vmatpush3.bf16.msra.mxu1 %v2388_v7 }
0x134c   : > { %3193 = vmatprep.subr.bf16.mxu1 %v3799_v0 }
0x1402   : > { %v2217_v47 = vpop.f32.mrf.mxu1 }
0x1403   : > { %v2223_v48 = vpack.c.bf16 %v2217_v47, %v2217_v47  ;;  %v2925_v47 = vld [vmem:[%s4475_s14] ss:$0 sm:$0xff] }
0x1404   : > { %v3159_v23 = vpop.f32.mrf.mxu1 }
0x1405   : > { %3164 = vmatmul.mubr.msk.bf16.vlgmr.msra.gmra.mxu0 %vm970_vm2, %v2223_v48 }
0x1406   : > { %v2220_v49 = vpop.f32.mrf.mxu1  ;;  %3175 = vmatprep.mubr.msk.bf16.mxu0 %vm3800_vm0, %v3799_v0 }
0x1408   : > { %v3160_v50 = vpop.f32.mrf.mxu1 }
0x140a   : > { %v2315_v51 = vpop.f32.mrf.mxu1 }
0x140b   : > { %v2321_v52 = vmul.f32 0.35355338, %v2315_v51 }
0x140c   : > { %v3171_v53 = vpop.f32.mrf.mxu1 }
0x140d   : > { %v2322_v54 = vadd.f32 %v2321_v52, %v4286_v13 }
0x140e   : > { %v2318_v55 = vpop.f32.mrf.mxu1 }
0x140f   : > { %v2323_v56 = vsel %vm970_vm2, %v2322_v54, -inf }
0x1410   : > { %2324 = vmax.xlane.f32.xlu1 %v2323_v56  ;;  %v3172_v58 = vpop.f32.mrf.mxu1 }
0x1499   : > { %v2325_v59 = vpop.xlane.xlu1 %2324 }
0x149a   : > { %v2326_v60 = vsub.f32 %v2322_v54, %v2325_v59  ;;  %v2929_v54 = vld [vmem:[#allocation17] ss:$0 sm:$0xff] }
0x149c   : > { %v2327_v61 = vmul.f32 1.442695, %v2326_v60 }
0x149e   : > { %3417 = vpow2.f32 %v2327_v61 }
0x14ab   : > { %v3418_v62 = vpop.eup %3417 }
0x14ac   : > { %v2329_v1 = vsel %vm970_vm2, %v3418_v62, 0.0 }
0x14ad   : > { %2330 = vadd.xlane.f32.xlu0 %v2329_v1 }
0x14c3   : > { %2335 = vrot.lane.b32.xlu0 %v4294_v27, %s4526_s23  ;;  %s791_s23 = sand.u32 1, %s3769_s30  }
0x14c4   : > { %s2873_s20 = sshll.u32 %s791_s23, 3  ;;  %s2637_s3 = scalar_lea.sflag [#allocation4], %s791_s23 }
0x14c5   : > { %v2264_v2 = vpop.f32.mrf.mxu0  ;;  %s793_s25 = scalar_lea.vmem [#allocation19], %s2873_s20 }
0x14c6   : > { %v2270_v3 = vadd.f32 %v2264_v2, %v2110_v35  ;;  %v3384_v35 = vld [vmem:[%s4476_s15 + $0x10] sm:$0xff]   ;;  %s2651_s22 = sshll.u32 %s793_s25, 4  ;;  %s2652_s22 = int_to_ptr.vmem [resolvable:$true] %s2651_s22 }
0x14c7   : > { %v3165_v4 = vpop.f32.mrf.mxu0  ;;  %s3685_s2 = scalar_lea.vmem %s2652_s22, 128  ;;  %p3692_p8 = scmp.lt.s32.totalorder %s2652_s22, %s3690_s1 }
0x14c8   : > { %p3686_p0 = scmp.ne.s32.totalorder %s2652_s22, %s3685_s2  ;;  %p3693_p10 = scmp.lt.s32.totalorder %s3691_s21, %s3685_s2 }
0x14c9   : > { %v2267_v13 = vpop.f32.mrf.mxu0 }
0x14ca   : > { %p3687_p2 = pnand %p3686_p0, %p4529_p1  ;;  %p3694_p11 = por %p3693_p10, %p3692_p8 }
0x14cb   : > { %v3166_v8 = vpop.f32.mrf.mxu0 }
0x14cc   : > { %p3688_p4 = pneg %p3687_p2 }
0x14ce   : > { %p3695_p3 = pnand %p3694_p11, %p3688_p4 }
0x1536   : > { %v2331_v10 = vpop.xlane.xlu0 %2330 }
0x1537   : > { %3419 = vrcp.f32 %v2331_v10  ;;  %v2935_v10 = vld [vmem:[%s4478_s17 + $0x2] ss:$0 sm:$0xff] }
0x153a   : > { %v2336_v11 = vpop.permute.xlu0 %2335 }
0x153b   : > { %v2341_v12 = vsel %vm1037_vm3, %v2336_v11, 0 }
0x153c   : > { %3174 = vmatpush3.bf16.msra.mxu0 %v2341_v12  ;;  %v2936_v12 = vld [vmem:[%s4479_s18 + $0x2] ss:$0 sm:$0xff] }
0x153d   : > { %3185 = vmatprep.subr.bf16.mxu0 %v3799_v0 }
0x1544   : > { %v3420_v27 = vpop.eup %3419 }
0x1545   : > { %v2333_v25 = vmul.f32 %v3420_v27, %v3418_v62 }
0x1547   : > { %v2334_v14 = vpack.c.bf16 %v2333_v25, %v2333_v25 }
0x1549   : > { %3176 = vmatmul.mubr.msk.bf16.vlgmr.msra.gmra.mxu0 %vm970_vm2, %v2334_v14 }
0x154a   : > { %3189 = vmatprep.mubr.msk.bf16.mxu0 %vm3800_vm0, %v3799_v0  ;;  %3186 = vmatpush3.bf16.msra.mxu0 %v3381_v34 }
0x154b   : > { %3187 = vmatprep.subr.bf16.mxu0 %v3799_v0 }
0x154e   : > { %3188 = vmatpush3.bf16.msra.mxu0 %v3382_v9 }
0x1609   : > { %v2377_v16 = vpop.f32.mrf.mxu0 }
0x160a   : > { %v2383_v17 = vpack.c.bf16 %v2377_v16, %v2377_v16 }
0x160b   : > { %v3177_v18 = vpop.f32.mrf.mxu0 }
0x160c   : > { %3182 = vmatmul.mubr.msk.bf16.vlgmr.msra.gmra.mxu1 %vm970_vm2, %v2383_v17 }
0x160d   : > { %v2380_v19 = vpop.f32.mrf.mxu0  ;;  %3201 = vmatprep.mubr.msk.bf16.mxu1 %vm3800_vm0, %v3799_v0 }
0x160f   : > { %v3178_v20 = vpop.f32.mrf.mxu0 }
0x16cc   : > { %v2424_v36 = vpop.f32.mrf.mxu1 }
0x16cd   : > { %v2430_v21 = vadd.f32 %v2424_v36, %v2270_v3 }
0x16ce   : > { %v3183_v22 = vpop.f32.mrf.mxu1 }
0x16cf   : > { %v2431_v24 = vadd.f32 %v2430_v21, %v4262_v57  ;;  %v3383_v57 = vld [vmem:[%s4476_s15 + $0x18] sm:$0xff]  }
0x16d0   : > { %v2427_v26 = vpop.f32.mrf.mxu1  ;;  %3194 = vmatpush3.bf16.msra.mxu1 %v3383_v57 }
0x16d1   : > { %v2434_v28 = vsel %vm837_vm1, %v2431_v24, 0.0  ;;  %3195 = vmatprep.subr.bf16.mxu1 %v3799_v0 }
0x16d2   : > { %2435 = vadd.xlane.f32.xlu0 %v2434_v28  ;;  %v3184_v29 = vpop.f32.mrf.mxu1 }
0x16d4   : > { %3196 = vmatpush3.bf16.msra.mxu1 %v3384_v35 }
0x16d5   : > { %3197 = vmatprep.subr.bf16.mxu1 %v3799_v0 }
0x16d8   : > { %3198 = vmatpush3.bf16.msra.mxu1 %v3385_v15 }
0x16d9   : > { %3199 = vmatprep.subr.bf16.mxu1 %v3799_v0 }
0x16dc   : > { %3200 = vmatpush3.bf16.msra.mxu1 %v3386_v6 }
0x175b   : > { %v2436_v30 = vpop.xlane.xlu0 %2435 }
0x175c   : > { %v2437_v31 = vmul.f32 0.03125, %v2436_v30 }
0x175e   : > { %v2438_v32 = vsub.f32 %v2431_v24, %v2437_v31 }
0x1760   : > { %v2439_v33 = vmul.f32 %v2438_v32, %v2438_v32 }
0x1762   : > { %v2440_v63 = vsel %vm837_vm1, %v2439_v33, 0.0 }
0x1763   : > { %2441 = vadd.xlane.f32.xlu1 %v2440_v63 }
0x17ec   : > { %v2442_v37 = vpop.xlane.xlu1 %2441 }
0x17ed   : > { %v2443_v38 = vmul.f32 0.03125, %v2442_v37 }
0x17ef   : > { %v2444_v39 = vadd.f32 1e-05, %v2443_v38 }
0x17f1   : > { %3421 = vrsqrt.f32 %v2444_v39 }
0x17fe   : > { %v3422_v40 = vpop.eup %3421 }
0x17ff   : > { %v2446_v42 = vmul.f32 %v3422_v40, %v2438_v32 }
0x1801   : > { %v2451_v44 = vmul.f32 %v2923_v41, %v2446_v42 }
0x1803   : > { %v2456_v45 = vadd.f32 %v2924_v43, %v2451_v44 }
0x1805   : > { %v2457_v46 = vpack.c.bf16 %v2456_v45, %v2456_v45 }
0x1807   : > { %3190 = vmatmul.mubr.msk.bf16.vlgmr.msra.gmra.mxu0 %vm837_vm1, %v2457_v46 }
0x18c7   : > { %v2518_v48 = vpop.f32.mrf.mxu0 }
0x18c8   : > { %v2519_v23 = vadd.f32 %v2925_v47, %v2518_v48 }
0x18c9   : > { %v3191_v49 = vpop.f32.mrf.mxu0 }
0x18ca   : > { %v2524_v50 = vmax.f32 %v2519_v23, 0.0 }
0x18cb   : > { %v2521_v51 = vpop.f32.mrf.mxu0 }
0x18cc   : > { %v2525_v52 = vpack.c.bf16 %v2524_v50, %v2524_v50 }
0x18cd   : > { %v3192_v53 = vpop.f32.mrf.mxu0 }
0x18ce   : > { %3202 = vmatmul.mubr.msk.bf16.vlgmr.msra.gmra.mxu1 %vm2565_vm4, %v2525_v52 }
0x198e   : > { %v2603_v0 = vpop.f32.mrf.mxu1 }
0x198f   : > { %v2604_v55 = vadd.f32 %v2929_v54, %v2603_v0 }
0x1990   : > { %v3203_v56 = vpop.f32.mrf.mxu1 }
0x1991   : > { %v2609_v58 = vadd.f32 %v2604_v55, %v2456_v45 }
0x1992   : > { %v2606_v59 = vpop.f32.mrf.mxu1 }
0x1993   : > { %v2612_v60 = vsel %vm837_vm1, %v2609_v58, 0.0 }
0x1994   : > { %2613 = vadd.xlane.f32.xlu1 %v2612_v60  ;;  %v3204_v61 = vpop.f32.mrf.mxu1 }
0x1a1d   : > { %v2614_v62 = vpop.xlane.xlu1 %2613 }
0x1a1e   : > { %v2615_v1 = vmul.f32 0.03125, %v2614_v62 }
0x1a20   : > { %v2616_v2 = vsub.f32 %v2609_v58, %v2615_v1 }
0x1a22   : > { %v2617_v3 = vmul.f32 %v2616_v2, %v2616_v2 }
0x1a24   : > { %v2618_v4 = vsel %vm837_vm1, %v2617_v3, 0.0 }
0x1a25   : > { %2619 = vadd.xlane.f32.xlu1 %v2618_v4 }
0x1aae   : > { %v2620_v13 = vpop.xlane.xlu1 %2619 }
0x1aaf   : > { %v2621_v5 = vmul.f32 0.03125, %v2620_v13 }
0x1ab1   : > { %v2622_v7 = vadd.f32 1e-05, %v2621_v5 }
0x1ab3   : > { %3423 = vrsqrt.f32 %v2622_v7 }
0x1ac0   : > { %v3424_v8 = vpop.eup %3423 }
0x1ac1   : > { %v2624_v11 = vmul.f32 %v3424_v8, %v2616_v2 }
0x1ac3   : > { %v2629_v27 = vmul.f32 %v2935_v10, %v2624_v11 }
0x1ac5   : > { %v2634_v25 = vadd.f32 %v2936_v12, %v2629_v27 }
0x1ac7   : > { %2635 = vst.msk [vmem:[%s793_s25] sm:$0xff] %vm837_vm1, %v2634_v25 }
0x1ac8   : > { %3698 = shalt.err (!%p3695_p3)
}
0x1ac9   : > { %s3699_s20 = scalar_lea.hbm %s2649_s26, 128  ;;  %s3703_s29 = scalar_lea.hbm %s4528_s4, 256 }
0x1aca   : > { %p3700_p5 = scmp.ne.s32.totalorder %s2649_s26, %s3699_s20  ;;  %p3704_p9 = scmp.lt.s32.totalorder %s2649_s26, %s4528_s4 }
0x1acb   : > { %p3705_p12 = scmp.lt.s32.totalorder %s3703_s29, %s3699_s20 }
0x1acc   : > { %p3701_p6 = pnand %p3700_p5, %p4529_p1 }
0x1acd   : > { %p3706_p13 = por %p3705_p12, %p3704_p9 }
0x1ace   : > { %p3702_p7 = pneg %p3701_p6 }
0x1ad0   : > { %p3707_p0 = pnand %p3706_p13, %p3702_p7 }
0x1ad2   : > { %3710 = shalt.err (!%p3707_p0)
}
0x1ad3   : > { %3245 = dma.vmem_to_hbm [thread:$0]  (%p4529_p1), %s2652_s22, 128, %s2649_s26, %s2637_s3  }
0x1ad4 PF: > { %s4530_s27 = sld [smem:[#allocation30_spill]] }
0x1ad5   : > { %s4531_s2 = sld [smem:[#allocation27_spill]] }
0x1ad6   : > { %s4532_s28 = sld [smem:[#allocation33_spill]] }
0x1ada   : > { %p3302_p2 = scmp.ge.s32.totalorder %s4530_s27, 2 }
0x1adb   : > { %s2663_s1 = sand.u32 1, %s4531_s2  }
0x1adc   : > { %p4533_p4 = scmp.ne.s32.totalorder %s4532_s28, 0  ;;  %s2664_s21 = scalar_lea.sflag [#allocation4], %s2663_s1 }
0x1ade   : > { %p3279_p8 = pnand %p3302_p2, %p4533_p4 }
0x1ae0   : > { %p3280_p10 = pneg %p3279_p8 }
0x1ae2   : > { %3760 = dma.done.wait (%p3280_p10), %s2664_s21, 128  }
0x1ae3   : > { %3762 = vsyncadd (%p3280_p10), %s2664_s21, 4294967168  ;;  %s38_s22 = sadd.s32 1, %s4530_s27   ;;  %s4534_s20 = sld [smem:[#allocation28_spill]] }
0x1ae4   : > { %p35_p11 = scmp.ge.s32.totalorder %s38_s22, 4   ;;  %s4535_s23 = sld [smem:[#allocation34_spill]] }
0x1ae5   : > { %s4536_s21 = sld [smem:[#allocation29_spill]]  ;;  %s4538_s0 = smov %s3769_s30 }
0x1ae6   : > { %s4537_s1 = sld [smem:[#allocation31_spill]]  ;;  %37 = sbr.rel (!%p35_p11) target bundleno = 17 (0x11), region = 180 }
0x1ae9   : > { %s4539_s30 = smov %s4534_s20 }
0x1aea   : > { %s4540_s20 = smov %s4535_s23 }
0x1aeb   :  { %2669 = vsyncpa [#allocation3], 1 }
0x1aec   :  { %2671 = vsyncpa [#allocation3 + $0x1], 1 }
0x1aed   :  { %2672 = vsyncpa [#allocation6], 1 }
0x1aee   :  { %2673 = vsyncpa [#allocation9], 1 }
0x1aef   :  { %2674 = vsyncpa [#allocation12], 1 }
0x1af0   :  { %2675 = vsyncpa [#allocation15], 1 }
0x1af1   :  { %2676 = vsyncpa [#allocation18], 1 }
0x1af2   :  { %2677 = vsyncpa [#allocation4], 1 }
0x1af3   :  { %2679 = vsyncpa [#allocation4 + $0x1], 1 }

</bundles_post_ra>
